<compile_context>
chip_gen: v7x
topology: tpu7x:2x2x1
jax: 0.10.0
libtpu: 0.0.40
codegen_flags: <defaults>
</compile_context>

<pallas_src>
import functools

import jax
import jax.numpy as jnp
import numpy as np
from jax import lax
from jax.experimental import pallas as pl
from jax.experimental.pallas import tpu as pltpu


def _resblock_kernel(x_ref, w1_ref, w2_ref, b1_ref, b2_ref, o_ref):
    # x_ref, o_ref: (H, NT, W*C)   activations, lane axis = W*C
    # w*_ref:       (3*W*C, W*C)   banded bf16 conv weights (BN scale folded)
    # b*_ref:       (1, W*C)       folded BN bias (f32), tiled over W
    h, nt, wc = x_ref.shape
    x = x_ref[...].astype(jnp.float32)

    def im2row(a):
        # Build the 3 dy taps by shifting along the leading (untiled) H axis
        # and stack them along lanes -> (H*NT, 3*W*C).  Zero rows implement
        # SAME padding in H; zero weight columns handle padding in W.
        zero = jnp.zeros((1, nt, wc), a.dtype)
        up = jnp.concatenate([zero, a[:h - 1]], axis=0)    # input row y-1
        dn = jnp.concatenate([a[1:], zero], axis=0)        # input row y+1
        cat = jnp.concatenate([up, a, dn], axis=2)         # (H, NT, 3*W*C)
        return cat.reshape(h * nt, 3 * wc)

    # conv1 (+ folded bn1 scale): one big-K MXU matmul (bf16 in, f32 acc),
    # then bias + relu in f32.
    y1 = jnp.dot(im2row(x.astype(jnp.bfloat16)), w1_ref[...],
                 preferred_element_type=jnp.float32)
    y1 = jnp.maximum(y1 + b1_ref[...], 0.0)                # (H*NT, W*C) f32

    # conv2 (+ folded bn2 scale), bias, residual add (f32 input), relu.
    y2 = jnp.dot(im2row(y1.astype(jnp.bfloat16).reshape(h, nt, wc)),
                 w2_ref[...], preferred_element_type=jnp.float32)
    out = jnp.maximum(y2 + b2_ref[...] + x.reshape(h * nt, wc), 0.0)

    o_ref[...] = out.reshape(h, nt, wc).astype(o_ref.dtype)


def _banded_weight(w_hwio, scale, width, dtype=jnp.bfloat16):
    """Fold BN scale into the 3x3 conv weight and expand the dx taps +
    channel mixing into a banded (3*W*C, W*C) matrix.

    K index layout is (ky, wi, ci); N index layout is (wo, co), matching the
    in-kernel lane layout [row y-1 | row y | row y+1] with each row as
    (w, c)-major lanes.  Zero columns implement SAME padding in W.
    One-time host-side prep (numpy) — keep this off the per-call path.
    """
    wf = (np.asarray(w_hwio, np.float32)
          * np.asarray(scale, np.float32)[None, None, None, :])
    kh, kw, cin, cout = wf.shape
    big = np.zeros((kh, width, cin, width, cout), np.float32)
    for kx in range(kw):
        for wo in range(width):
            wi = wo + kx - 1          # input column feeding output column wo
            if 0 <= wi < width:
                big[:, wi, :, wo, :] = wf[:, kx, :, :]
    return jnp.asarray(big.reshape(kh * width * cin, width * cout), dtype=dtype)


def prepare_residual_block_params(w1_hwio, w2_hwio, scale1, bias1,
                                  scale2, bias2, width,
                                  weight_dtype=jnp.bfloat16):
    """One-time parameter prep: banded bf16 weights + tiled f32 biases."""
    w1b = _banded_weight(w1_hwio, scale1, width, weight_dtype)
    w2b = _banded_weight(w2_hwio, scale2, width, weight_dtype)
    b1t = jnp.tile(jnp.asarray(bias1, jnp.float32), width).reshape(1, -1)
    b2t = jnp.tile(jnp.asarray(bias2, jnp.float32), width).reshape(1, -1)
    return w1b, w2b, b1t, b2t


def residual_block(x_nchw, w1b, w2b, b1t, b2t, n_tile=None):
    """Jittable wrapper; params come from prepare_residual_block_params."""
    N, C, H, W = x_nchw.shape
    wc = W * C

    if n_tile is None:
        # Single grid step: v5e/v6e have a single TensorCore so extra steps
        # are pure per-step overhead; on v7x only override (n_tile = N//2,
        # 8-aligned) once per-step M = H*n_tile is >= ~256.
        n_tile = N
    assert N % n_tile == 0, "batch must be divisible by n_tile"
    grid = (N // n_tile,)

    # NCHW -> (H, N, W*C): channels (and W) on the lane axis, the conv's dy
    # halo on the leading untiled axis.
    x_hnwc = jnp.transpose(x_nchw, (2, 0, 3, 1)).reshape(H, N, wc)

    def const_spec(shape):
        # Constant operands: same block every step -> single-buffer them.
        return pl.BlockSpec(shape, lambda n: (0, 0),
                            pipeline_mode=pl.Buffered(1))

    out_hnwc = pl.pallas_call(
        _resblock_kernel,
        out_shape=jax.ShapeDtypeStruct((H, N, wc), x_nchw.dtype),
        grid_spec=pltpu.PrefetchScalarGridSpec(
            num_scalar_prefetch=0,
            grid=grid,
            in_specs=[
                pl.BlockSpec((H, n_tile, wc), lambda n: (0, n, 0)),
                const_spec((3 * wc, wc)),
                const_spec((3 * wc, wc)),
                const_spec((1, wc)),
                const_spec((1, wc)),
            ],
            out_specs=pl.BlockSpec((H, n_tile, wc), lambda n: (0, n, 0)),
        ),
        compiler_params=pltpu.CompilerParams(
            dimension_semantics=("parallel",)),
    )(x_hnwc, w1b, w2b, b1t, b2t)

    out = out_hnwc.reshape(H, N, W, C)
    return jnp.transpose(out, (1, 3, 0, 2))   # back to NCHW


def residual_block_ref(x_nchw, w1_hwio, w2_hwio, scale1, bias1, scale2, bias2):
    """Plain-JAX f32 reference (for correctness check)."""
    x = jnp.transpose(x_nchw, (0, 2, 3, 1))
    dn = ("NHWC", "HWIO", "NHWC")
    y = lax.conv_general_dilated(x, w1_hwio, (1, 1), "SAME",
                                 dimension_numbers=dn)
    y = jnp.maximum(y * scale1 + bias1, 0.0)
    y = lax.conv_general_dilated(y, w2_hwio, (1, 1), "SAME",
                                 dimension_numbers=dn)
    y = jnp.maximum(y * scale2 + bias2 + x, 0.0)
    return jnp.transpose(y, (0, 3, 1, 2))


def _fold_bn(gamma, beta, running_mean, running_var, eps=1e-5):
    scale = gamma / jnp.sqrt(running_var + eps)
    bias = beta - running_mean * scale
    return scale, bias


if __name__ == "__main__":
    # Small shapes consistent with the module (chess board is 8x8).
    N, C, H, W = 16, 32, 8, 8

    key = jax.random.PRNGKey(0)
    keys = jax.random.split(key, 12)

    x = jax.random.normal(keys[0], (N, C, H, W), jnp.float32)

    # Conv weights in PyTorch OIHW -> transpose to HWIO for NHWC conv.
    w1_oihw = 0.1 * jax.random.normal(keys[1], (C, C, 3, 3), jnp.float32)
    w2_oihw = 0.1 * jax.random.normal(keys[2], (C, C, 3, 3), jnp.float32)
    w1_hwio = jnp.transpose(w1_oihw, (2, 3, 1, 0))
    w2_hwio = jnp.transpose(w2_oihw, (2, 3, 1, 0))

    # BatchNorm parameters (deterministic, eval-mode running stats).
    g1 = 1.0 + 0.1 * jax.random.normal(keys[3], (C,), jnp.float32)
    b1 = 0.1 * jax.random.normal(keys[4], (C,), jnp.float32)
    m1 = 0.05 * jax.random.normal(keys[5], (C,), jnp.float32)
    v1 = 1.0 + 0.1 * jnp.abs(jax.random.normal(keys[6], (C,), jnp.float32))
    g2 = 1.0 + 0.1 * jax.random.normal(keys[7], (C,), jnp.float32)
    b2 = 0.1 * jax.random.normal(keys[8], (C,), jnp.float32)
    m2 = 0.05 * jax.random.normal(keys[9], (C,), jnp.float32)
    v2 = 1.0 + 0.1 * jnp.abs(jax.random.normal(keys[10], (C,), jnp.float32))

    scale1, bias1 = _fold_bn(g1, b1, m1, v1)
    scale2, bias2 = _fold_bn(g2, b2, m2, v2)

    # One-time prep (off the per-call path), then a jitted per-call wrapper.
    w1b, w2b, b1t, b2t = prepare_residual_block_params(
        w1_hwio, w2_hwio, scale1, bias1, scale2, bias2, W)
    res_fn = jax.jit(functools.partial(residual_block, n_tile=None))

    out = res_fn(x, w1b, w2b, b1t, b2t)
    out = jax.block_until_ready(out)

    ref = residual_block_ref(x, w1_hwio, w2_hwio, scale1, bias1, scale2, bias2)
    # bf16 weights/LHS -> relaxed tolerance vs the f32 reference.
    np.testing.assert_allclose(np.asarray(out), np.asarray(ref),
                               rtol=3e-2, atol=6e-2)

    print("KERNEL_OK")
</pallas_src>

<mosaic_0001>
module attributes {stable_mosaic.version = 11 : i64} {
  func.func @_resblock_kernel(%arg0: i32, %arg1: memref<8x16x256xf32, #tpu.memory_space<vmem>>, %arg2: memref<768x256xbf16, #tpu.memory_space<vmem>>, %arg3: memref<768x256xbf16, #tpu.memory_space<vmem>>, %arg4: memref<1x256xf32, #tpu.memory_space<vmem>>, %arg5: memref<1x256xf32, #tpu.memory_space<vmem>>, %arg6: memref<8x16x256xf32, #tpu.memory_space<vmem>>) attributes {dimension_semantics = [#tpu.dimension_semantics<parallel>], iteration_bounds = array<i64: 1>, scalar_prefetch = 0 : i64, scratch_operands = 0 : i64, tpu.core_type = #tpu.core_type<tc>, window_params = [{transform_indices = @transform_0, window_bounds = array<i64: 8, 16, 256>}, {pipeline_mode = #tpu.pipeline_mode<synchronous>, transform_indices = @transform_1, window_bounds = array<i64: 768, 256>}, {pipeline_mode = #tpu.pipeline_mode<synchronous>, transform_indices = @transform_2, window_bounds = array<i64: 768, 256>}, {pipeline_mode = #tpu.pipeline_mode<synchronous>, transform_indices = @transform_3, window_bounds = array<i64: 1, 256>}, {pipeline_mode = #tpu.pipeline_mode<synchronous>, transform_indices = @transform_4, window_bounds = array<i64: 1, 256>}, {transform_indices = @transform_5, window_bounds = array<i64: 8, 16, 256>}]} {
    %c0 = arith.constant 0 : index
    %c0_0 = arith.constant 0 : index
    %c0_1 = arith.constant 0 : index
    %0 = vector.load %arg1[%c0, %c0_0, %c0_1] : memref<8x16x256xf32, #tpu.memory_space<vmem>>, vector<8x16x256xf32>
    %1 = arith.truncf %0 : vector<8x16x256xf32> to vector<8x16x256xbf16>
    %cst = arith.constant 0.000000e+00 : bf16
    %2 = vector.broadcast %cst : bf16 to vector<1x16x256xbf16>
    %3 = vector.extract_strided_slice %1 {offsets = [0, 0, 0], sizes = [7, 16, 256], strides = [1, 1, 1]} : vector<8x16x256xbf16> to vector<7x16x256xbf16>
    %4 = tpu.concatenate %2, %3 in 0 : vector<1x16x256xbf16>, vector<7x16x256xbf16> -> vector<8x16x256xbf16>
    %5 = vector.extract_strided_slice %1 {offsets = [1, 0, 0], sizes = [7, 16, 256], strides = [1, 1, 1]} : vector<8x16x256xbf16> to vector<7x16x256xbf16>
    %6 = tpu.concatenate %5, %2 in 0 : vector<7x16x256xbf16>, vector<1x16x256xbf16> -> vector<8x16x256xbf16>
    %7 = tpu.concatenate %4, %1, %6 in 2 : vector<8x16x256xbf16>, vector<8x16x256xbf16>, vector<8x16x256xbf16> -> vector<8x16x768xbf16>
    %8 = vector.shape_cast %7 : vector<8x16x768xbf16> to vector<128x768xbf16>
    %c0_2 = arith.constant 0 : index
    %c0_3 = arith.constant 0 : index
    %9 = vector.load %arg2[%c0_2, %c0_3] : memref<768x256xbf16, #tpu.memory_space<vmem>>, vector<768x256xbf16>
    %cst_4 = arith.constant dense<0.000000e+00> : vector<128x256xf32>
    %10 = tpu.matmul %8, %9, %cst_4 {dimension_numbers = #tpu.dot_dimension_numbers<[1], [0], [0], [1], [0, 0, 1, 1], [], []>} : vector<128x768xbf16>, vector<768x256xbf16>, vector<128x256xf32> -> vector<128x256xf32>
    %c0_5 = arith.constant 0 : index
    %c0_6 = arith.constant 0 : index
    %11 = vector.load %arg4[%c0_5, %c0_6] : memref<1x256xf32, #tpu.memory_space<vmem>>, vector<1x256xf32>
    %12 = vector.broadcast %11 : vector<1x256xf32> to vector<128x256xf32>
    %13 = arith.addf %10, %12 : vector<128x256xf32>
    %cst_7 = arith.constant 0.000000e+00 : f32
    %14 = vector.broadcast %cst_7 : f32 to vector<128x256xf32>
    %15 = arith.maximumf %13, %14 : vector<128x256xf32>
    %16 = arith.truncf %15 : vector<128x256xf32> to vector<128x256xbf16>
    %17 = vector.shape_cast %16 : vector<128x256xbf16> to vector<8x16x256xbf16>
    %cst_8 = arith.constant 0.000000e+00 : bf16
    %18 = vector.broadcast %cst_8 : bf16 to vector<1x16x256xbf16>
    %19 = vector.extract_strided_slice %17 {offsets = [0, 0, 0], sizes = [7, 16, 256], strides = [1, 1, 1]} : vector<8x16x256xbf16> to vector<7x16x256xbf16>
    %20 = tpu.concatenate %18, %19 in 0 : vector<1x16x256xbf16>, vector<7x16x256xbf16> -> vector<8x16x256xbf16>
    %21 = vector.extract_strided_slice %17 {offsets = [1, 0, 0], sizes = [7, 16, 256], strides = [1, 1, 1]} : vector<8x16x256xbf16> to vector<7x16x256xbf16>
    %22 = tpu.concatenate %21, %18 in 0 : vector<7x16x256xbf16>, vector<1x16x256xbf16> -> vector<8x16x256xbf16>
    %23 = tpu.concatenate %20, %17, %22 in 2 : vector<8x16x256xbf16>, vector<8x16x256xbf16>, vector<8x16x256xbf16> -> vector<8x16x768xbf16>
    %24 = vector.shape_cast %23 : vector<8x16x768xbf16> to vector<128x768xbf16>
    %c0_9 = arith.constant 0 : index
    %c0_10 = arith.constant 0 : index
    %25 = vector.load %arg3[%c0_9, %c0_10] : memref<768x256xbf16, #tpu.memory_space<vmem>>, vector<768x256xbf16>
    %cst_11 = arith.constant dense<0.000000e+00> : vector<128x256xf32>
    %26 = tpu.matmul %24, %25, %cst_11 {dimension_numbers = #tpu.dot_dimension_numbers<[1], [0], [0], [1], [0, 0, 1, 1], [], []>} : vector<128x768xbf16>, vector<768x256xbf16>, vector<128x256xf32> -> vector<128x256xf32>
    %c0_12 = arith.constant 0 : index
    %c0_13 = arith.constant 0 : index
    %27 = vector.load %arg5[%c0_12, %c0_13] : memref<1x256xf32, #tpu.memory_space<vmem>>, vector<1x256xf32>
    %28 = vector.broadcast %27 : vector<1x256xf32> to vector<128x256xf32>
    %29 = arith.addf %26, %28 : vector<128x256xf32>
    %30 = vector.shape_cast %0 : vector<8x16x256xf32> to vector<128x256xf32>
    %31 = arith.addf %29, %30 : vector<128x256xf32>
    %cst_14 = arith.constant 0.000000e+00 : f32
    %32 = vector.broadcast %cst_14 : f32 to vector<128x256xf32>
    %33 = arith.maximumf %31, %32 : vector<128x256xf32>
    %34 = vector.shape_cast %33 : vector<128x256xf32> to vector<8x16x256xf32>
    %c0_15 = arith.constant 0 : index
    %c0_16 = arith.constant 0 : index
    %c0_17 = arith.constant 0 : index
    %35 = vector.load %arg6[%c0_15, %c0_16, %c0_17] : memref<8x16x256xf32, #tpu.memory_space<vmem>>, vector<8x16x256xf32>
    tpu.vector_store %arg6[%c0_15, %c0_16, %c0_17], %34 {strides = array<i32>} : memref<8x16x256xf32, #tpu.memory_space<vmem>>, vector<8x16x256xf32>,
    return
  }
  func.func @transform_0(%arg0: i32) -> (i32, i32, i32) {
    %c0_i32 = arith.constant 0 : i32
    %c0_i32_0 = arith.constant 0 : i32
    %c0_i32_1 = arith.constant 0 : i32
    return %c0_i32, %arg0, %c0_i32_0 : i32, i32, i32
  }
  func.func @transform_1(%arg0: i32) -> (i32, i32) {
    %c0_i32 = arith.constant 0 : i32
    %c0_i32_0 = arith.constant 0 : i32
    %c0_i32_1 = arith.constant 0 : i32
    return %c0_i32, %c0_i32_0 : i32, i32
  }
  func.func @transform_2(%arg0: i32) -> (i32, i32) {
    %c0_i32 = arith.constant 0 : i32
    %c0_i32_0 = arith.constant 0 : i32
    %c0_i32_1 = arith.constant 0 : i32
    return %c0_i32, %c0_i32_0 : i32, i32
  }
  func.func @transform_3(%arg0: i32) -> (i32, i32) {
    %c0_i32 = arith.constant 0 : i32
    %c0_i32_0 = arith.constant 0 : i32
    %c0_i32_1 = arith.constant 0 : i32
    return %c0_i32, %c0_i32_0 : i32, i32
  }
  func.func @transform_4(%arg0: i32) -> (i32, i32) {
    %c0_i32 = arith.constant 0 : i32
    %c0_i32_0 = arith.constant 0 : i32
    %c0_i32_1 = arith.constant 0 : i32
    return %c0_i32, %c0_i32_0 : i32, i32
  }
  func.func @transform_5(%arg0: i32) -> (i32, i32, i32) {
    %c0_i32 = arith.constant 0 : i32
    %c0_i32_0 = arith.constant 0 : i32
    %c0_i32_1 = arith.constant 0 : i32
    return %c0_i32, %arg0, %c0_i32_0 : i32, i32, i32
  }
}

</mosaic_0001>

<bundles_post_ra>
// kernel: residual_block.1
= control target key start
LH: loop header
LB: loop body
LE: loop exit
PB: predicated region body
PF: predicated region fallthrough
CT: control target
= control target key end

     0   :  { %v2772_v1 = vmov 0   ;;  %s3913_s1 = inlined_call_operand.vmem [shape: bf16[768,256], index: 1, kind: input, shape index: {}]   ;;  %s3914_s0 = inlined_call_operand.vmem [shape: f32[8,16,256], index: 0, kind: input, shape index: {}]   ;;  %s3915_s2 = inlined_call_operand.vmem [shape: bf16[768,256], index: 2, kind: input, shape index: {}]   ;;  %s3916_s3 = inlined_call_operand.vmem [shape: f32[1,256], index: 3, kind: input, shape index: {}]   ;;  %s3917_s4 = inlined_call_operand.vmem [shape: f32[1,256], index: 4, kind: input, shape index: {}]   ;;  %s3918_s5 = inlined_call_operand.vmem [shape: f32[8,16,256], index: 5, kind: output, shape index: {}]  }
   0x1   :  { %v2456_v0 = vld [vmem:[%s3913_s1 + $0x4] ss:$8 sps:$4 sm:$0xff]   ;;  %689 = vmatprep.mubr.bf16.mxu0 %v2772_v1  ;;  %1664 = vmatprep.mubr.bf16.mxu1 %v2772_v1  ;;  %v2458_v2 = vld [vmem:[%s3913_s1] ss:$8 sps:$4 sm:$0xff]   ;;  %v2459_v3 = vld [vmem:[%s3913_s1 + $0x14] ss:$8 sps:$4 sm:$0xff]  }
   0x2   :  { %657 = vmatprep.subr.bf16.mxu0 %v2456_v0  ;;  %v2461_v4 = vld [vmem:[%s3913_s1 + $0x10] ss:$8 sps:$4 sm:$0xff]   ;;  %v2462_v5 = vld [vmem:[%s3913_s1 + $0x24] ss:$8 sps:$4 sm:$0xff]   ;;  %v2464_v6 = vld [vmem:[%s3913_s1 + $0x20] ss:$8 sps:$4 sm:$0xff]  }
   0x3   :  { %658 = vmatpush1.bf16.msra.mxu0 %v2458_v2  ;;  %v2465_v7 = vld [vmem:[%s3913_s1 + $0x34] ss:$8 sps:$4 sm:$0xff]   ;;  %v2467_v8 = vld [vmem:[%s3913_s1 + $0x30] ss:$8 sps:$4 sm:$0xff]   ;;  %v2468_v9 = vld [vmem:[%s3913_s1 + $0x44] ss:$8 sps:$4 sm:$0xff]  }
   0x4   :  { %659 = vmatprep.subr.bf16.mxu0 %v2459_v3  ;;  %v2470_v10 = vld [vmem:[%s3913_s1 + $0x40] ss:$8 sps:$4 sm:$0xff]   ;;  %v2471_v11 = vld [vmem:[%s3913_s1 + $0x54] ss:$8 sps:$4 sm:$0xff]   ;;  %v2473_v12 = vld [vmem:[%s3913_s1 + $0x50] ss:$8 sps:$4 sm:$0xff]  }
   0x5   :  { %v2474_v13 = vld [vmem:[%s3913_s1 + $0x64] ss:$8 sps:$4 sm:$0xff]   ;;  %v2476_v14 = vld [vmem:[%s3913_s1 + $0x60] ss:$8 sps:$4 sm:$0xff]   ;;  %v2477_v15 = vld [vmem:[%s3913_s1 + $0x74] ss:$8 sps:$4 sm:$0xff]  }
   0x6   :  { %v2479_v16 = vld [vmem:[%s3913_s1 + $0x70] ss:$8 sps:$4 sm:$0xff]   ;;  %v2480_v17 = vld [vmem:[%s3913_s1 + $0x84] ss:$8 sps:$4 sm:$0xff]   ;;  %v2482_v18 = vld [vmem:[%s3913_s1 + $0x80] ss:$8 sps:$4 sm:$0xff]  }
   0x7   :  { %660 = vmatpush1.bf16.msra.mxu0 %v2461_v4  ;;  %v2483_v19 = vld [vmem:[%s3913_s1 + $0x94] ss:$8 sps:$4 sm:$0xff]   ;;  %v2485_v20 = vld [vmem:[%s3913_s1 + $0x90] ss:$8 sps:$4 sm:$0xff]   ;;  %v2486_v21 = vld [vmem:[%s3913_s1 + $0xa4] ss:$8 sps:$4 sm:$0xff]  }
   0x8   :  { %661 = vmatprep.subr.bf16.mxu0 %v2462_v5  ;;  %v2488_v22 = vld [vmem:[%s3913_s1 + $0xa0] ss:$8 sps:$4 sm:$0xff]   ;;  %v2489_v23 = vld [vmem:[%s3913_s1 + $0xb4] ss:$8 sps:$4 sm:$0xff]   ;;  %v2491_v24 = vld [vmem:[%s3913_s1 + $0xb0] ss:$8 sps:$4 sm:$0xff]  }
   0x9   :  { %v2492_v25 = vld [vmem:[%s3913_s1 + $0xc4] ss:$8 sps:$4 sm:$0xff]   ;;  %v2494_v26 = vld [vmem:[%s3913_s1 + $0xc0] ss:$8 sps:$4 sm:$0xff]   ;;  %v2495_v27 = vld [vmem:[%s3913_s1 + $0xd4] ss:$8 sps:$4 sm:$0xff]  }
   0xa   :  { %v2497_v28 = vld [vmem:[%s3913_s1 + $0xd0] ss:$8 sps:$4 sm:$0xff]   ;;  %v2498_v29 = vld [vmem:[%s3913_s1 + $0xe4] ss:$8 sps:$4 sm:$0xff]   ;;  %v2500_v30 = vld [vmem:[%s3913_s1 + $0xe0] ss:$8 sps:$4 sm:$0xff]  }
   0xb   :  { %662 = vmatpush1.bf16.msra.mxu0 %v2464_v6  ;;  %v2501_v31 = vld [vmem:[%s3913_s1 + $0xf4] ss:$8 sps:$4 sm:$0xff]   ;;  %v2503_v32 = vld [vmem:[%s3913_s1 + $0xf0] ss:$8 sps:$4 sm:$0xff]   ;;  %v2506_v33 = vld [vmem:[%s3913_s1 + $0x104] ss:$8 sps:$4 sm:$0xff]  }
   0xc   :  { %663 = vmatprep.subr.bf16.mxu0 %v2465_v7  ;;  %v22_v34 = vld [vmem:[%s3914_s0 + $0x8] sm:$0xff]  ;;  %v24_v35 = vld [vmem:[%s3914_s0 + $0x18] sm:$0xff]  ;;  %v21_v40 = vld [vmem:[%s3914_s0] sm:$0xff] }
   0xd   :  { %v2504_v36 = vld [vmem:[%s3913_s1 + $0x100] ss:$8 sps:$4 sm:$0xff]   ;;  %v2913_v37 = vpack.c.bf16 %v24_v35, %v22_v34  ;;  %v2509_v38 = vld [vmem:[%s3913_s1 + $0x114] ss:$8 sps:$4 sm:$0xff]   ;;  %v2507_v39 = vld [vmem:[%s3913_s1 + $0x110] ss:$8 sps:$4 sm:$0xff]  }
   0xe   :  { %v23_v41 = vld [vmem:[%s3914_s0 + $0x10] sm:$0xff]  ;;  %v2512_v42 = vld [vmem:[%s3913_s1 + $0x124] ss:$8 sps:$4 sm:$0xff]   ;;  %v28_v44 = vld [vmem:[%s3914_s0 + $0x38] sm:$0xff] }
   0xf   :  { %664 = vmatpush1.bf16.msra.mxu0 %v2467_v8  ;;  %v26_v43 = vld [vmem:[%s3914_s0 + $0x28] sm:$0xff]  ;;  %v2938_v45 = vpack.c.bf16 %v23_v41, %v21_v40  ;;  %v2515_v48 = vld [vmem:[%s3913_s1 + $0x134] ss:$8 sps:$4 sm:$0xff]   ;;  %v2513_v49 = vld [vmem:[%s3913_s1 + $0x130] ss:$8 sps:$4 sm:$0xff]  }
  0x10   :  { %665 = vmatprep.subr.bf16.mxu0 %v2468_v9  ;;  %v2510_v46 = vld [vmem:[%s3913_s1 + $0x120] ss:$8 sps:$4 sm:$0xff]   ;;  %v2943_v47 = vpack.c.bf16 %v28_v44, %v26_v43  ;;  %v27_v51 = vld [vmem:[%s3914_s0 + $0x30] sm:$0xff]  ;;  %v2518_v52 = vld [vmem:[%s3913_s1 + $0x144] ss:$8 sps:$4 sm:$0xff]  }
  0x11   :  { %v25_v50 = vld [vmem:[%s3914_s0 + $0x20] sm:$0xff]  ;;  %v30_v53 = vld [vmem:[%s3914_s0 + $0x48] sm:$0xff]  ;;  %v32_v54 = vld [vmem:[%s3914_s0 + $0x58] sm:$0xff] }
  0x12   :  { %v2968_v55 = vpack.c.bf16 %v27_v51, %v25_v50  ;;  %v2516_v56 = vld [vmem:[%s3913_s1 + $0x140] ss:$8 sps:$4 sm:$0xff]   ;;  %v2973_v57 = vpack.c.bf16 %v32_v54, %v30_v53  ;;  %v2521_v58 = vld [vmem:[%s3913_s1 + $0x154] ss:$8 sps:$4 sm:$0xff]   ;;  %v2519_v59 = vld [vmem:[%s3913_s1 + $0x150] ss:$8 sps:$4 sm:$0xff]  }
  0x13   :  { %666 = vmatpush1.bf16.msra.mxu0 %v2470_v10  ;;  %v29_v60 = vld [vmem:[%s3914_s0 + $0x40] sm:$0xff]  ;;  %v31_v61 = vld [vmem:[%s3914_s0 + $0x50] sm:$0xff]  ;;  %v34_v63 = vld [vmem:[%s3914_s0 + $0x68] sm:$0xff] }
  0x14   :  { %667 = vmatprep.subr.bf16.mxu0 %v2471_v11  ;;  %v2524_v62 = vld [vmem:[%s3913_s1 + $0x164] ss:$8 sps:$4 sm:$0xff]   ;;  %v36_v0 = vld [vmem:[%s3914_s0 + $0x78] sm:$0xff]  ;;  %v2998_v2 = vpack.c.bf16 %v31_v61, %v29_v60  ;;  %v2522_v3 = vld [vmem:[%s3913_s1 + $0x160] ss:$8 sps:$4 sm:$0xff]  }
  0x15   :  { %v3003_v4 = vpack.c.bf16 %v36_v0, %v34_v63  ;;  %v2527_v5 = vld [vmem:[%s3913_s1 + $0x174] ss:$8 sps:$4 sm:$0xff]   ;;  %v2525_v6 = vld [vmem:[%s3913_s1 + $0x170] ss:$8 sps:$4 sm:$0xff]   ;;  %v33_v7 = vld [vmem:[%s3914_s0 + $0x60] sm:$0xff] }
  0x16   :  { %v35_v8 = vld [vmem:[%s3914_s0 + $0x70] sm:$0xff]  ;;  %v2530_v9 = vld [vmem:[%s3913_s1 + $0x184] ss:$8 sps:$4 sm:$0xff]   ;;  %v40_v11 = vld [vmem:[%s3914_s0 + $0x98] sm:$0xff] }
  0x17   :  { %668 = vmatpush1.bf16.msra.mxu0 %v2473_v12  ;;  %v38_v10 = vld [vmem:[%s3914_s0 + $0x88] sm:$0xff]  ;;  %v3028_v12 = vpack.c.bf16 %v35_v8, %v33_v7  ;;  %v2545_v35 = vld [vmem:[%s3913_s1 + $0x1d4] ss:$8 sps:$4 sm:$0xff]   ;;  %v2549_v44 = vld [vmem:[%s3913_s1 + $0x1f0] ss:$8 sps:$4 sm:$0xff]  }
  0x18   :  { %669 = vmatprep.subr.bf16.mxu0 %v2474_v13  ;;  %v2528_v13 = vld [vmem:[%s3913_s1 + $0x180] ss:$8 sps:$4 sm:$0xff]   ;;  %v2548_v40 = vld [vmem:[%s3913_s1 + $0x1e4] ss:$8 sps:$4 sm:$0xff]   ;;  %v2551_v43 = vld [vmem:[%s3913_s1 + $0x1f4] ss:$8 sps:$4 sm:$0xff]  }
  0x19   :  { %v2603_v50 = vld [vmem:[%s3915_s2 + $0x14] ss:$8 sps:$4 sm:$0xff]   ;;  %v2552_v51 = vld [vmem:[%s3913_s1 + $0x200] ss:$8 sps:$4 sm:$0xff]   ;;  %v2606_v53 = vld [vmem:[%s3915_s2 + $0x24] ss:$8 sps:$4 sm:$0xff]  }
  0x1a   :  { %v2555_v54 = vld [vmem:[%s3913_s1 + $0x210] ss:$8 sps:$4 sm:$0xff]   ;;  %v2563_v61 = vld [vmem:[%s3913_s1 + $0x234] ss:$8 sps:$4 sm:$0xff]   ;;  %v2614_v0 = vld [vmem:[%s3915_s2 + $0x40] ss:$8 sps:$4 sm:$0xff]  }
  0x1b   :  { %670 = vmatpush1.bf16.msra.mxu0 %v2476_v14  ;;  %v3033_v14 = vpack.c.bf16 %v40_v11, %v38_v10  ;;  %v2611_v60 = vld [vmem:[%s3915_s2 + $0x30] ss:$8 sps:$4 sm:$0xff]   ;;  %v2569_v7 = vld [vmem:[%s3913_s1 + $0x254] ss:$8 sps:$4 sm:$0xff]   ;;  %v2620_v10 = vld [vmem:[%s3915_s2 + $0x60] ss:$8 sps:$4 sm:$0xff]  }
  0x1c   :  { %671 = vmatprep.subr.bf16.mxu0 %v2477_v15  ;;  %v2533_v15 = vld [vmem:[%s3913_s1 + $0x194] ss:$8 sps:$4 sm:$0xff]   ;;  %v2561_v63 = vld [vmem:[%s3913_s1 + $0x230] ss:$8 sps:$4 sm:$0xff]  }
  0x1d   :  { %v2617_v8 = vld [vmem:[%s3915_s2 + $0x50] ss:$8 sps:$4 sm:$0xff]  }
  0x1e   :  { %v2567_v11 = vld [vmem:[%s3913_s1 + $0x250] ss:$8 sps:$4 sm:$0xff]  }
  0x1f   :  { %672 = vmatpush1.bf16.msra.mxu0 %v2479_v16  ;;  %v2531_v16 = vld [vmem:[%s3913_s1 + $0x190] ss:$8 sps:$4 sm:$0xff]  }
  0x20   :  { %673 = vmatprep.subr.bf16.mxu0 %v2480_v17  ;;  %v37_v17 = vld [vmem:[%s3914_s0 + $0x80] sm:$0xff] }
  0x23   :  { %674 = vmatpush1.bf16.msra.mxu0 %v2482_v18  ;;  %v39_v18 = vld [vmem:[%s3914_s0 + $0x90] sm:$0xff] }
  0x24   :  { %675 = vmatprep.subr.bf16.mxu0 %v2483_v19  ;;  %v2536_v19 = vld [vmem:[%s3913_s1 + $0x1a4] ss:$8 sps:$4 sm:$0xff]  }
  0x27   :  { %676 = vmatpush1.bf16.msra.mxu0 %v2485_v20  ;;  %v42_v20 = vld [vmem:[%s3914_s0 + $0xa8] sm:$0xff] }
  0x28   :  { %677 = vmatprep.subr.bf16.mxu0 %v2486_v21  ;;  %v44_v21 = vld [vmem:[%s3914_s0 + $0xb8] sm:$0xff] }
  0x2b   :  { %678 = vmatpush1.bf16.msra.mxu0 %v2488_v22  ;;  %v3058_v22 = vpack.c.bf16 %v39_v18, %v37_v17  ;;  %v2570_v17 = vld [vmem:[%s3913_s1 + $0x260] ss:$8 sps:$4 sm:$0xff]   ;;  %v2575_v18 = vld [vmem:[%s3913_s1 + $0x274] ss:$8 sps:$4 sm:$0xff]  }
  0x2c   :  { %679 = vmatprep.subr.bf16.mxu0 %v2489_v23  ;;  %v2534_v23 = vld [vmem:[%s3913_s1 + $0x1a0] ss:$8 sps:$4 sm:$0xff]  }
  0x2f   :  { %680 = vmatpush1.bf16.msra.mxu0 %v2491_v24  ;;  %v3063_v24 = vpack.c.bf16 %v44_v21, %v42_v20  ;;  %v2626_v20 = vld [vmem:[%s3915_s2 + $0x80] ss:$8 sps:$4 sm:$0xff]   ;;  %v2573_v21 = vld [vmem:[%s3913_s1 + $0x270] ss:$8 sps:$4 sm:$0xff]  }
  0x30   :  { %681 = vmatprep.subr.bf16.mxu0 %v2492_v25  ;;  %v2539_v25 = vld [vmem:[%s3913_s1 + $0x1b4] ss:$8 sps:$4 sm:$0xff]  }
  0x33   :  { %682 = vmatpush1.bf16.msra.mxu0 %v2494_v26  ;;  %v2537_v26 = vld [vmem:[%s3913_s1 + $0x1b0] ss:$8 sps:$4 sm:$0xff]  }
  0x34   :  { %683 = vmatprep.subr.bf16.mxu0 %v2495_v27  ;;  %v41_v27 = vld [vmem:[%s3914_s0 + $0xa0] sm:$0xff] }
  0x37   :  { %684 = vmatpush1.bf16.msra.mxu0 %v2497_v28  ;;  %v43_v28 = vld [vmem:[%s3914_s0 + $0xb0] sm:$0xff] }
  0x38   :  { %685 = vmatprep.subr.bf16.mxu0 %v2498_v29  ;;  %v2542_v29 = vld [vmem:[%s3913_s1 + $0x1c4] ss:$8 sps:$4 sm:$0xff]  }
  0x3b   :  { %686 = vmatpush1.bf16.msra.mxu0 %v2500_v30  ;;  %v46_v30 = vld [vmem:[%s3914_s0 + $0xc8] sm:$0xff] }
  0x3c   :  { %687 = vmatprep.subr.bf16.mxu0 %v2501_v31  ;;  %v48_v31 = vld [vmem:[%s3914_s0 + $0xd8] sm:$0xff] }
  0x3d   :  { %v3093_v34 = vpack.c.bf16 %v48_v31, %v46_v30  ;;  %v2632_v30 = vld [vmem:[%s3915_s2 + $0xa0] ss:$8 sps:$4 sm:$0xff]   ;;  %v2579_v31 = vld [vmem:[%s3913_s1 + $0x290] ss:$8 sps:$4 sm:$0xff]  }
  0x3f   :  { %688 = vmatpush1.bf16.msra.mxu0 %v2503_v32  ;;  %v3088_v32 = vpack.c.bf16 %v43_v28, %v41_v27  ;;  %v2576_v27 = vld [vmem:[%s3913_s1 + $0x280] ss:$8 sps:$4 sm:$0xff]   ;;  %v2581_v28 = vld [vmem:[%s3913_s1 + $0x294] ss:$8 sps:$4 sm:$0xff]  }
  0x40   :  { %770 = vmatprep.subr.bf16.mxu0 %v2506_v33  ;;  %v2540_v33 = vld [vmem:[%s3913_s1 + $0x1c0] ss:$8 sps:$4 sm:$0xff]  }
  0x42   :  { %690 = vmatmul.mubr.bf16.vlgmr.msra.gmra.mrb[0].mxu0 %v2772_v1 }
  0x43   :  { %771 = vmatpush1.bf16.msra.mxu0 %v2504_v36  ;;  %699 = vmatprep.mubr.bf16.mxu0 %v2913_v37  ;;  %v2543_v36 = vld [vmem:[%s3913_s1 + $0x1d0] ss:$8 sps:$4 sm:$0xff]  }
  0x44   :  { %772 = vmatprep.subr.bf16.mxu0 %v2509_v38  ;;  %v45_v38 = vld [vmem:[%s3914_s0 + $0xc0] sm:$0xff] }
  0x47   :  { %773 = vmatpush1.bf16.msra.mxu0 %v2507_v39  ;;  %v47_v39 = vld [vmem:[%s3914_s0 + $0xd0] sm:$0xff] }
  0x48   :  { %774 = vmatprep.subr.bf16.mxu0 %v2512_v42  ;;  %v3112_v41 = vpack.c.bf16 %v47_v39, %v45_v38  ;;  %v2546_v42 = vld [vmem:[%s3913_s1 + $0x1e0] ss:$8 sps:$4 sm:$0xff]   ;;  %v2587_v39 = vld [vmem:[%s3913_s1 + $0x2b4] ss:$8 sps:$4 sm:$0xff]  }
  0x49   :  { %v2582_v38 = vld [vmem:[%s3913_s1 + $0x2a0] ss:$8 sps:$4 sm:$0xff]  }
  0x4a   :  { %700 = vmatmul.mubr.bf16.gmra.mrb[4].mxu0 %v2938_v45 }
  0x4b   :  { %775 = vmatpush1.bf16.msra.mxu0 %v2510_v46  ;;  %709 = vmatprep.mubr.bf16.mxu0 %v2943_v47  ;;  %v2554_v46 = vld [vmem:[%s3913_s1 + $0x204] ss:$8 sps:$4 sm:$0xff]  }
  0x4c   :  { %776 = vmatprep.subr.bf16.mxu0 %v2515_v48  ;;  %v2600_v48 = vld [vmem:[%s3915_s2 + $0x4] ss:$8 sps:$4 sm:$0xff]  }
  0x4d   :  { %1632 = vmatprep.subr.bf16.mxu1 %v2600_v48  ;;  %v3296_v48 = vld [vmem:[%s3914_s0 + $0xe8] sm:$0xff] }
  0x4f   :  { %777 = vmatpush1.bf16.msra.mxu0 %v2513_v49  ;;  %v2602_v49 = vld [vmem:[%s3915_s2] ss:$8 sps:$4 sm:$0xff]  }
  0x50   :  { %778 = vmatprep.subr.bf16.mxu0 %v2518_v52  ;;  %1633 = vmatpush1.bf16.msra.mxu1 %v2602_v49  ;;  %v2557_v52 = vld [vmem:[%s3913_s1 + $0x214] ss:$8 sps:$4 sm:$0xff]  }
  0x51   :  { %1634 = vmatprep.subr.bf16.mxu1 %v2603_v50  ;;  %v3301_v49 = vld [vmem:[%s3914_s0 + $0xf8] sm:$0xff] }
  0x52   :  { %710 = vmatmul.mubr.bf16.gmra.mrb[8].mxu0 %v2968_v55  ;;  %v2641_v50 = vld [vmem:[%s3915_s2 + $0xd0] ss:$8 sps:$4 sm:$0xff]  }
  0x53   :  { %779 = vmatpush1.bf16.msra.mxu0 %v2516_v56  ;;  %719 = vmatprep.mubr.bf16.mxu0 %v2973_v57  ;;  %v2608_v56 = vld [vmem:[%s3915_s2 + $0x20] ss:$8 sps:$4 sm:$0xff]  }
  0x54   :  { %780 = vmatprep.subr.bf16.mxu0 %v2521_v58  ;;  %v2609_v58 = vld [vmem:[%s3915_s2 + $0x34] ss:$8 sps:$4 sm:$0xff]  }
  0x57   :  { %781 = vmatpush1.bf16.msra.mxu0 %v2519_v59  ;;  %v2558_v59 = vld [vmem:[%s3913_s1 + $0x220] ss:$8 sps:$4 sm:$0xff]  }
  0x58   :  { %782 = vmatprep.subr.bf16.mxu0 %v2524_v62  ;;  %v2612_v62 = vld [vmem:[%s3915_s2 + $0x44] ss:$8 sps:$4 sm:$0xff]  }
  0x5a   :  { %720 = vmatmul.mubr.bf16.gmra.mrb[12].mxu0 %v2998_v2 }
  0x5b   :  { %783 = vmatpush1.bf16.msra.mxu0 %v2522_v3  ;;  %729 = vmatprep.mubr.bf16.mxu0 %v3003_v4  ;;  %v2615_v3 = vld [vmem:[%s3915_s2 + $0x54] ss:$8 sps:$4 sm:$0xff]  }
  0x5c   :  { %784 = vmatprep.subr.bf16.mxu0 %v2527_v5  ;;  %v2566_v5 = vld [vmem:[%s3913_s1 + $0x244] ss:$8 sps:$4 sm:$0xff]  }
  0x5f   :  { %785 = vmatpush1.bf16.msra.mxu0 %v2525_v6  ;;  %v2564_v6 = vld [vmem:[%s3913_s1 + $0x240] ss:$8 sps:$4 sm:$0xff]  }
  0x60   :  { %786 = vmatprep.subr.bf16.mxu0 %v2530_v9  ;;  %v2618_v9 = vld [vmem:[%s3915_s2 + $0x64] ss:$8 sps:$4 sm:$0xff]  }
  0x62   :  { %730 = vmatmul.mubr.bf16.gmra.mrb[16].mxu0 %v3028_v12 }
  0x63   :  { %787 = vmatpush1.bf16.msra.mxu0 %v2528_v13  ;;  %739 = vmatprep.mubr.bf16.mxu0 %v3033_v14  ;;  %v2621_v13 = vld [vmem:[%s3915_s2 + $0x74] ss:$8 sps:$4 sm:$0xff]  }
  0x64   :  { %788 = vmatprep.subr.bf16.mxu0 %v2533_v15  ;;  %v2572_v15 = vld [vmem:[%s3913_s1 + $0x264] ss:$8 sps:$4 sm:$0xff]  }
  0x67   :  { %789 = vmatpush1.bf16.msra.mxu0 %v2531_v16  ;;  %v2623_v16 = vld [vmem:[%s3915_s2 + $0x70] ss:$8 sps:$4 sm:$0xff]  }
  0x68   :  { %790 = vmatprep.subr.bf16.mxu0 %v2536_v19  ;;  %v2624_v19 = vld [vmem:[%s3915_s2 + $0x84] ss:$8 sps:$4 sm:$0xff]  }
  0x6a   :  { %740 = vmatmul.mubr.bf16.gmra.mrb[20].mxu0 %v3058_v22 }
  0x6b   :  { %791 = vmatpush1.bf16.msra.mxu0 %v2534_v23  ;;  %749 = vmatprep.mubr.bf16.mxu0 %v3063_v24  ;;  %v2627_v23 = vld [vmem:[%s3915_s2 + $0x94] ss:$8 sps:$4 sm:$0xff]  }
  0x6c   :  { %792 = vmatprep.subr.bf16.mxu0 %v2539_v25  ;;  %v2578_v25 = vld [vmem:[%s3913_s1 + $0x284] ss:$8 sps:$4 sm:$0xff]  }
  0x6f   :  { %793 = vmatpush1.bf16.msra.mxu0 %v2537_v26  ;;  %v2629_v26 = vld [vmem:[%s3915_s2 + $0x90] ss:$8 sps:$4 sm:$0xff]  }
  0x70   :  { %794 = vmatprep.subr.bf16.mxu0 %v2542_v29  ;;  %v2630_v29 = vld [vmem:[%s3915_s2 + $0xa4] ss:$8 sps:$4 sm:$0xff]  }
  0x72   :  { %750 = vmatmul.mubr.bf16.gmra.mrb[24].mxu0 %v3088_v32 }
  0x73   :  { %795 = vmatpush1.bf16.msra.mxu0 %v2540_v33  ;;  %759 = vmatprep.mubr.bf16.mxu0 %v3093_v34  ;;  %v2633_v33 = vld [vmem:[%s3915_s2 + $0xb4] ss:$8 sps:$4 sm:$0xff]  }
  0x74   :  { %796 = vmatprep.subr.bf16.mxu0 %v2545_v35  ;;  %v2584_v35 = vld [vmem:[%s3913_s1 + $0x2a4] ss:$8 sps:$4 sm:$0xff]  }
  0x77   :  { %797 = vmatpush1.bf16.msra.mxu0 %v2543_v36  ;;  %v2635_v36 = vld [vmem:[%s3915_s2 + $0xb0] ss:$8 sps:$4 sm:$0xff]  }
  0x78   :  { %798 = vmatprep.subr.bf16.mxu0 %v2548_v40  ;;  %v2636_v40 = vld [vmem:[%s3915_s2 + $0xc4] ss:$8 sps:$4 sm:$0xff]  }
  0x7a   :  { %760 = vmatmul.mubr.bf16.gmra.mrb[28].mxu0 %v3112_v41 }
  0x7b   :  { %799 = vmatpush1.bf16.msra.mxu0 %v2546_v42  ;;  %802 = vmatprep.mubr.bf16.mxu0 %v2913_v37  ;;  %v2605_v37 = vld [vmem:[%s3915_s2 + $0x10] ss:$8 sps:$4 sm:$0xff]   ;;  %v2638_v42 = vld [vmem:[%s3915_s2 + $0xc0] ss:$8 sps:$4 sm:$0xff]  }
  0x7c   :  { %800 = vmatprep.subr.bf16.mxu0 %v2551_v43  ;;  %1635 = vmatpush1.bf16.msra.mxu1 %v2605_v37  ;;  %v2585_v43 = vld [vmem:[%s3913_s1 + $0x2b0] ss:$8 sps:$4 sm:$0xff]   ;;  %v68_v37 = vpack.c.bf16 %v3301_v49, %v3296_v48 }
  0x7d   :  { %1636 = vmatprep.subr.bf16.mxu1 %v2606_v53  ;;  %v2642_v53 = vld [vmem:[%s3915_s2 + $0xe4] ss:$8 sps:$4 sm:$0xff]  }
  0x7f   :  { %801 = vmatpush1.bf16.msra.mxu0 %v2549_v44  ;;  %v2639_v44 = vld [vmem:[%s3915_s2 + $0xd4] ss:$8 sps:$4 sm:$0xff]  }
  0x80   :  { %883 = vmatprep.subr.bf16.mxu0 %v2554_v46  ;;  %1637 = vmatpush1.bf16.msra.mxu1 %v2608_v56  ;;  %v2590_v46 = vld [vmem:[%s3913_s1 + $0x2c4] ss:$8 sps:$4 sm:$0xff]   ;;  %v2644_v56 = vld [vmem:[%s3915_s2 + $0xe0] ss:$8 sps:$4 sm:$0xff]  }
  0x81   :  { %1638 = vmatprep.subr.bf16.mxu1 %v2609_v58  ;;  %v3327_v58 = vld [vmem:[%s3914_s0 + $0xe0] sm:$0xff] }
  0x82   :  { %803 = vmatmul.mubr.bf16.vlgmr.msra.gmra.mrb[0].mxu0 %v2938_v45  ;;  %v2560_v45 = vld [vmem:[%s3913_s1 + $0x224] ss:$8 sps:$4 sm:$0xff]  }
  0x83   :  { %884 = vmatpush1.bf16.msra.mxu0 %v2552_v51  ;;  %812 = vmatprep.mubr.bf16.mxu0 %v2943_v47  ;;  %v2588_v51 = vld [vmem:[%s3913_s1 + $0x2c0] ss:$8 sps:$4 sm:$0xff]  }
  0x84   :  { %885 = vmatprep.subr.bf16.mxu0 %v2557_v52  ;;  %1639 = vmatpush1.bf16.msra.mxu1 %v2611_v60  ;;  %v2593_v52 = vld [vmem:[%s3913_s1 + $0x2d4] ss:$8 sps:$4 sm:$0xff]   ;;  %v2596_v60 = vld [vmem:[%s3913_s1 + $0x2e4] ss:$8 sps:$4 sm:$0xff]  }
  0x85   :  { %1640 = vmatprep.subr.bf16.mxu1 %v2612_v62  ;;  %v2594_v62 = vld [vmem:[%s3913_s1 + $0x2e0] ss:$8 sps:$4 sm:$0xff]  }
  0x87   :  { %886 = vmatpush1.bf16.msra.mxu0 %v2555_v54  ;;  %v2591_v54 = vld [vmem:[%s3913_s1 + $0x2d0] ss:$8 sps:$4 sm:$0xff]  }
  0x88   :  { %887 = vmatprep.subr.bf16.mxu0 %v2560_v45  ;;  %1641 = vmatpush1.bf16.msra.mxu1 %v2614_v0  ;;  %v3332_v45 = vld [vmem:[%s3914_s0 + $0xf0] sm:$0xff] }
  0x89   :  { %1642 = vmatprep.subr.bf16.mxu1 %v2615_v3  ;;  %v2597_v0 = vld [vmem:[%s3913_s1 + $0x2f0] ss:$8 sps:$4 sm:$0xff]  }
  0x8a   :  { %813 = vmatmul.mubr.bf16.gmra.mrb[4].mxu0 %v2968_v55  ;;  %v2663_v3 = vld [vmem:[%s3915_s2 + $0x150] ss:$8 sps:$4 sm:$0xff]  }
  0x8b   :  { %888 = vmatpush1.bf16.msra.mxu0 %v2558_v59  ;;  %822 = vmatprep.mubr.bf16.mxu0 %v2973_v57  ;;  %v2645_v59 = vld [vmem:[%s3915_s2 + $0xf4] ss:$8 sps:$4 sm:$0xff]  }
  0x8c   :  { %889 = vmatprep.subr.bf16.mxu0 %v2563_v61  ;;  %1643 = vmatpush1.bf16.msra.mxu1 %v2617_v8  ;;  %v67_v61 = vpack.c.bf16 %v3332_v45, %v3327_v58  ;;  %v2669_v8 = vld [vmem:[%s3915_s2 + $0x170] ss:$8 sps:$4 sm:$0xff]  }
  0x8d   :  { %1644 = vmatprep.subr.bf16.mxu1 %v2618_v9  ;;  %v2674_v9 = vld [vmem:[%s3915_s2 + $0x184] ss:$8 sps:$4 sm:$0xff]  }
  0x8f   :  { %890 = vmatpush1.bf16.msra.mxu0 %v2561_v63  ;;  %v2599_v63 = vld [vmem:[%s3913_s1 + $0x2f4] ss:$8 sps:$4 sm:$0xff]  }
  0x90   :  { %891 = vmatprep.subr.bf16.mxu0 %v2566_v5  ;;  %1645 = vmatpush1.bf16.msra.mxu1 %v2620_v10  ;;  %v2668_v5 = vld [vmem:[%s3915_s2 + $0x164] ss:$8 sps:$4 sm:$0xff]   ;;  %v2672_v10 = vld [vmem:[%s3915_s2 + $0x180] ss:$8 sps:$4 sm:$0xff]  }
  0x91   :  { %1646 = vmatprep.subr.bf16.mxu1 %v2621_v13  ;;  %v2675_v13 = vld [vmem:[%s3915_s2 + $0x190] ss:$8 sps:$4 sm:$0xff]  }
  0x92   :  { %823 = vmatmul.mubr.bf16.gmra.mrb[8].mxu0 %v2998_v2 }
  0x93   :  { %892 = vmatpush1.bf16.msra.mxu0 %v2564_v6  ;;  %832 = vmatprep.mubr.bf16.mxu0 %v3003_v4  ;;  %v2666_v6 = vld [vmem:[%s3915_s2 + $0x160] ss:$8 sps:$4 sm:$0xff]  }
  0x94   :  { %893 = vmatprep.subr.bf16.mxu0 %v2569_v7  ;;  %1647 = vmatpush1.bf16.msra.mxu1 %v2623_v16  ;;  %v2671_v7 = vld [vmem:[%s3915_s2 + $0x174] ss:$8 sps:$4 sm:$0xff]   ;;  %v2678_v16 = vld [vmem:[%s3915_s2 + $0x1a0] ss:$8 sps:$4 sm:$0xff]  }
  0x95   :  { %1648 = vmatprep.subr.bf16.mxu1 %v2624_v19  ;;  %v2686_v19 = vld [vmem:[%s3915_s2 + $0x1c4] ss:$8 sps:$4 sm:$0xff]  }
  0x97   :  { %894 = vmatpush1.bf16.msra.mxu0 %v2567_v11  ;;  %v2677_v11 = vld [vmem:[%s3915_s2 + $0x194] ss:$8 sps:$4 sm:$0xff]  }
  0x98   :  { %895 = vmatprep.subr.bf16.mxu0 %v2572_v15  ;;  %1649 = vmatpush1.bf16.msra.mxu1 %v2626_v20  ;;  %v2680_v15 = vld [vmem:[%s3915_s2 + $0x1a4] ss:$8 sps:$4 sm:$0xff]   ;;  %v2684_v20 = vld [vmem:[%s3915_s2 + $0x1c0] ss:$8 sps:$4 sm:$0xff]  }
  0x99   :  { %1650 = vmatprep.subr.bf16.mxu1 %v2627_v23  ;;  %v2687_v23 = vld [vmem:[%s3915_s2 + $0x1d0] ss:$8 sps:$4 sm:$0xff]  }
  0x9a   :  { %833 = vmatmul.mubr.bf16.gmra.mrb[12].mxu0 %v3028_v12 }
  0x9b   :  { %896 = vmatpush1.bf16.msra.mxu0 %v2570_v17  ;;  %842 = vmatprep.mubr.bf16.mxu0 %v3033_v14  ;;  %v2683_v17 = vld [vmem:[%s3915_s2 + $0x1b4] ss:$8 sps:$4 sm:$0xff]  }
  0x9c   :  { %897 = vmatprep.subr.bf16.mxu0 %v2575_v18  ;;  %1651 = vmatpush1.bf16.msra.mxu1 %v2629_v26  ;;  %v2681_v18 = vld [vmem:[%s3915_s2 + $0x1b0] ss:$8 sps:$4 sm:$0xff]   ;;  %v2690_v26 = vld [vmem:[%s3915_s2 + $0x1e0] ss:$8 sps:$4 sm:$0xff]  }
  0x9d   :  { %1652 = vmatprep.subr.bf16.mxu1 %v2630_v29  ;;  %v2698_v29 = vld [vmem:[%s3915_s2 + $0x204] ss:$8 sps:$4 sm:$0xff]  }
  0x9f   :  { %898 = vmatpush1.bf16.msra.mxu0 %v2573_v21  ;;  %v2689_v21 = vld [vmem:[%s3915_s2 + $0x1d4] ss:$8 sps:$4 sm:$0xff]  }
  0xa0   :  { %899 = vmatprep.subr.bf16.mxu0 %v2578_v25  ;;  %1653 = vmatpush1.bf16.msra.mxu1 %v2632_v30  ;;  %v2692_v25 = vld [vmem:[%s3915_s2 + $0x1e4] ss:$8 sps:$4 sm:$0xff]   ;;  %v167_v30 = vlaneseq }
  0xa1   :  { %1654 = vmatprep.subr.bf16.mxu1 %v2633_v33 }
  0xa2   :  { %843 = vmatmul.mubr.bf16.gmra.mrb[16].mxu0 %v3058_v22 }
  0xa3   :  { %900 = vmatpush1.bf16.msra.mxu0 %v2576_v27  ;;  %852 = vmatprep.mubr.bf16.mxu0 %v3063_v24  ;;  %v2695_v27 = vld [vmem:[%s3915_s2 + $0x1f4] ss:$8 sps:$4 sm:$0xff]  }
  0xa4   :  { %901 = vmatprep.subr.bf16.mxu0 %v2581_v28  ;;  %1655 = vmatpush1.bf16.msra.mxu1 %v2635_v36  ;;  %v2693_v28 = vld [vmem:[%s3915_s2 + $0x1f0] ss:$8 sps:$4 sm:$0xff]  }
  0xa5   :  { %1656 = vmatprep.subr.bf16.mxu1 %v2636_v40 }
  0xa7   :  { %902 = vmatpush1.bf16.msra.mxu0 %v2579_v31  ;;  %v3468_v31 = vshrl.u32 %v167_v30, 7 }
  0xa8   :  { %903 = vmatprep.subr.bf16.mxu0 %v2584_v35  ;;  %1657 = vmatpush1.bf16.msra.mxu1 %v2638_v42  ;;  %v165_v35 = vld [vmem:[%s3916_s3] sm:$0x3] }
  0xa9   :  { %1658 = vmatprep.subr.bf16.mxu1 %v2639_v44  ;;  %v169_v33 = vsub.s32 0, %v3468_v31  ;;  %v173_v36 = vsub.s32 1, %v3468_v31  ;;  %v2745_v31 = vld [vmem:[%s3914_s0 + $0x8] sm:$0xff] }
  0xaa   :  { %853 = vmatmul.mubr.bf16.gmra.mrb[20].mxu0 %v3088_v32 }
  0xab   :  { %904 = vmatpush1.bf16.msra.mxu0 %v2582_v38  ;;  %862 = vmatprep.mubr.bf16.mxu0 %v3093_v34  ;;  %v3477_v38 = vrot.slane %v165_v35, %v169_v33 }
  0xac   :  { %905 = vmatprep.subr.bf16.mxu0 %v2587_v39  ;;  %1659 = vmatpush1.bf16.msra.mxu1 %v2641_v50  ;;  %v3481_v39 = vrot.slane %v165_v35, %v173_v36 }
  0xad   :  { %1660 = vmatprep.subr.bf16.mxu1 %v2642_v53 }
  0xaf   :  { %906 = vmatpush1.bf16.msra.mxu0 %v2585_v43 }
  0xb0   :  { %907 = vmatprep.subr.bf16.mxu0 %v2590_v46  ;;  %1661 = vmatpush1.bf16.msra.mxu1 %v2644_v56 }
  0xb1   :  { %1662 = vmatprep.subr.bf16.mxu1 %v2645_v59 }
  0xb2   :  { %863 = vmatmul.mubr.bf16.gmra.mrb[24].mxu0 %v3112_v41 }
  0xb3   :  { %908 = vmatpush1.bf16.msra.mxu0 %v2588_v51  ;;  %872 = vmatprep.mubr.bf16.mxu0 %v68_v37 }
  0xb4   :  { %909 = vmatprep.subr.bf16.mxu0 %v2593_v52 }
  0xb7   :  { %910 = vmatpush1.bf16.msra.mxu0 %v2591_v54 }
  0xb8   :  { %911 = vmatprep.subr.bf16.mxu0 %v2596_v60 }
  0xba   :  { %873 = vmatmul.mubr.bf16.gmra.mrb[28].mxu0 %v67_v61 }
  0xbb   :  { %912 = vmatpush1.bf16.msra.mxu0 %v2594_v62  ;;  %915 = vmatprep.mubr.bf16.mxu0 %v2943_v47  ;;  %v2647_v47 = vld [vmem:[%s3915_s2 + $0xf0] ss:$8 sps:$4 sm:$0xff]  }
  0xbc   :  { %913 = vmatprep.subr.bf16.mxu0 %v2599_v63  ;;  %1663 = vmatpush1.bf16.msra.mxu1 %v2647_v47 }
  0xbf   :  { %914 = vmatpush1.bf16.msra.mxu0 %v2597_v0  ;;  %1665 = vmatmul.mubr.bf16.vlgmr.msra.gmra.mrb[0].mxu1 %v2772_v1 }
  0xc2   :  { %916 = vmatmul.mubr.bf16.vlgmr.msra.gmra.mrb[0].mxu0 %v2968_v55  ;;  %v2650_v55 = vld [vmem:[%s3915_s2 + $0x104] ss:$8 sps:$4 sm:$0xff]  }
  0xc3   :  { %925 = vmatprep.mubr.bf16.mxu0 %v2973_v57  ;;  %v2648_v57 = vld [vmem:[%s3915_s2 + $0x100] ss:$8 sps:$4 sm:$0xff]   ;;  %1745 = vmatprep.subr.bf16.mxu1 %v2650_v55 }
  0xc4   :  { %1746 = vmatpush1.bf16.msra.mxu1 %v2648_v57 }
  0xca   :  { %926 = vmatmul.mubr.bf16.gmra.mrb[4].mxu0 %v2998_v2  ;;  %v2653_v2 = vld [vmem:[%s3915_s2 + $0x114] ss:$8 sps:$4 sm:$0xff]  }
  0xcb   :  { %935 = vmatprep.mubr.bf16.mxu0 %v3003_v4  ;;  %v2651_v4 = vld [vmem:[%s3915_s2 + $0x110] ss:$8 sps:$4 sm:$0xff]   ;;  %1747 = vmatprep.subr.bf16.mxu1 %v2653_v2 }
  0xcc   :  { %1748 = vmatpush1.bf16.msra.mxu1 %v2651_v4 }
  0xd2   :  { %936 = vmatmul.mubr.bf16.gmra.mrb[8].mxu0 %v3028_v12  ;;  %v2656_v12 = vld [vmem:[%s3915_s2 + $0x124] ss:$8 sps:$4 sm:$0xff]  }
  0xd3   :  { %945 = vmatprep.mubr.bf16.mxu0 %v3033_v14  ;;  %v2654_v14 = vld [vmem:[%s3915_s2 + $0x120] ss:$8 sps:$4 sm:$0xff]   ;;  %1749 = vmatprep.subr.bf16.mxu1 %v2656_v12 }
  0xd4   :  { %1750 = vmatpush1.bf16.msra.mxu1 %v2654_v14 }
  0xda   :  { %946 = vmatmul.mubr.bf16.gmra.mrb[12].mxu0 %v3058_v22  ;;  %v2659_v22 = vld [vmem:[%s3915_s2 + $0x134] ss:$8 sps:$4 sm:$0xff]  }
  0xdb   :  { %955 = vmatprep.mubr.bf16.mxu0 %v3063_v24  ;;  %v2657_v24 = vld [vmem:[%s3915_s2 + $0x130] ss:$8 sps:$4 sm:$0xff]   ;;  %1751 = vmatprep.subr.bf16.mxu1 %v2659_v22 }
  0xdc   :  { %1752 = vmatpush1.bf16.msra.mxu1 %v2657_v24 }
  0xe2   :  { %956 = vmatmul.mubr.bf16.gmra.mrb[16].mxu0 %v3088_v32  ;;  %v2662_v32 = vld [vmem:[%s3915_s2 + $0x144] ss:$8 sps:$4 sm:$0xff]  }
  0xe3   :  { %965 = vmatprep.mubr.bf16.mxu0 %v3093_v34  ;;  %v2660_v34 = vld [vmem:[%s3915_s2 + $0x140] ss:$8 sps:$4 sm:$0xff]   ;;  %1753 = vmatprep.subr.bf16.mxu1 %v2662_v32 }
  0xe4   :  { %1754 = vmatpush1.bf16.msra.mxu1 %v2660_v34 }
  0xea   :  { %966 = vmatmul.mubr.bf16.gmra.mrb[20].mxu0 %v3112_v41  ;;  %v2665_v41 = vld [vmem:[%s3915_s2 + $0x154] ss:$8 sps:$4 sm:$0xff]  }
  0xeb   :  { %975 = vmatprep.mubr.bf16.mxu0 %v68_v37  ;;  %1755 = vmatprep.subr.bf16.mxu1 %v2665_v41 }
  0xec   :  { %1756 = vmatpush1.bf16.msra.mxu1 %v2663_v3 }
  0xed   :  { %1757 = vmatprep.subr.bf16.mxu1 %v2668_v5 }
  0xf0   :  { %1758 = vmatpush1.bf16.msra.mxu1 %v2666_v6 }
  0xf1   :  { %1759 = vmatprep.subr.bf16.mxu1 %v2671_v7 }
  0xf2   :  { %976 = vmatmul.mubr.bf16.gmra.mrb[24].mxu0 %v67_v61 }
  0xf3   :  { %985 = vmatprep.mubr.bf16.mxu0 %v2772_v1 }
  0xf4   :  { %1760 = vmatpush1.bf16.msra.mxu1 %v2669_v8 }
  0xf5   :  { %1761 = vmatprep.subr.bf16.mxu1 %v2674_v9 }
  0xf8   :  { %1762 = vmatpush1.bf16.msra.mxu1 %v2672_v10 }
  0xf9   :  { %1763 = vmatprep.subr.bf16.mxu1 %v2677_v11 }
  0xfa   :  { %986 = vmatmul.mubr.bf16.gmra.mrb[28].mxu0 %v2772_v1 }
  0xfc   :  { %1764 = vmatpush1.bf16.msra.mxu1 %v2675_v13 }
  0xfd   :  { %1765 = vmatprep.subr.bf16.mxu1 %v2680_v15 }
 0x100   :  { %1766 = vmatpush1.bf16.msra.mxu1 %v2678_v16 }
 0x101   :  { %1767 = vmatprep.subr.bf16.mxu1 %v2683_v17 }
 0x104   :  { %1768 = vmatpush1.bf16.msra.mxu1 %v2681_v18 }
 0x105   :  { %1769 = vmatprep.subr.bf16.mxu1 %v2686_v19 }
 0x108   :  { %1770 = vmatpush1.bf16.msra.mxu1 %v2684_v20 }
 0x109   :  { %1771 = vmatprep.subr.bf16.mxu1 %v2689_v21 }
 0x10c   :  { %1772 = vmatpush1.bf16.msra.mxu1 %v2687_v23 }
 0x10d   :  { %1773 = vmatprep.subr.bf16.mxu1 %v2692_v25 }
 0x110   :  { %1774 = vmatpush1.bf16.msra.mxu1 %v2690_v26 }
 0x111   :  { %1775 = vmatprep.subr.bf16.mxu1 %v2695_v27 }
 0x114   :  { %1776 = vmatpush1.bf16.msra.mxu1 %v2693_v28 }
 0x115   :  { %1858 = vmatprep.subr.bf16.mxu1 %v2698_v29 }
 0x195   :  { %v917_v40 = vpop.f32.mrb[0].mxu0 }
 0x196   :  { %v2263_v42 = vadd.f32 %v917_v40, %v3477_v38  ;;  %v919_v43 = vpop.f32.mrb[1].mxu0 }
 0x197   :  { %v2264_v44 = vadd.f32 %v919_v43, %v3481_v39  ;;  %v921_v46 = vpop.f32.mrb[2].mxu0 }
 0x198   :  { %v2265_v50 = vadd.f32 %v921_v46, %v3477_v38  ;;  %v923_v51 = vpop.f32.mrb[3].mxu0  ;;  %v996_v52 = vmax.f32 %v2263_v42, 0.0 }
 0x199   :  { %v2266_v37 = vadd.f32 %v923_v51, %v3481_v39  ;;  %v997_v54 = vmax.f32 %v2264_v44, 0.0 }
 0x19a   :  { %v998_v53 = vmax.f32 %v2265_v50, 0.0 }
 0x19b   :  { %v999_v56 = vmax.f32 %v2266_v37, 0.0 }
 0x19c   :  { %v3487_v59 = vpack.c.bf16 %v998_v53, %v996_v52 }
 0x19d   :  { %v3489_v60 = vpack.c.bf16 %v999_v56, %v997_v54  ;;  %v927_v61 = vpop.f32.mrb[4].mxu0 }
 0x19e   :  { %v2267_v62 = vadd.f32 %v927_v61, %v3477_v38  ;;  %v929_v63 = vpop.f32.mrb[5].mxu0 }
 0x19f   :  { %v2268_v0 = vadd.f32 %v929_v63, %v3481_v39  ;;  %v931_v47 = vpop.f32.mrb[6].mxu0  ;;  %1674 = vmatprep.mubr.bf16.mxu1 %v3489_v60 }
 0x1a0   :  { %v2269_v55 = vadd.f32 %v931_v47, %v3477_v38  ;;  %v933_v57 = vpop.f32.mrb[7].mxu0  ;;  %1675 = vmatmul.mubr.bf16.gmra.mrb[4].mxu1 %v3487_v59  ;;  %v1000_v4 = vmax.f32 %v2267_v62, 0.0 }
 0x1a1   :  { %v2270_v2 = vadd.f32 %v933_v57, %v3481_v39  ;;  %v1001_v14 = vmax.f32 %v2268_v0, 0.0 }
 0x1a2   :  { %v1002_v12 = vmax.f32 %v2269_v55, 0.0 }
 0x1a3   :  { %v1003_v22 = vmax.f32 %v2270_v2, 0.0 }
 0x1a4   :  { %v3497_v24 = vpack.c.bf16 %v1002_v12, %v1000_v4 }
 0x1a5   :  { %v3499_v32 = vpack.c.bf16 %v1003_v22, %v1001_v14  ;;  %v937_v34 = vpop.f32.mrb[8].mxu0 }
 0x1a6   :  { %v2271_v41 = vadd.f32 %v937_v34, %v3477_v38  ;;  %v939_v3 = vpop.f32.mrb[9].mxu0 }
 0x1a7   :  { %v2272_v5 = vadd.f32 %v939_v3, %v3481_v39  ;;  %v941_v6 = vpop.f32.mrb[10].mxu0  ;;  %1684 = vmatprep.mubr.bf16.mxu1 %v3499_v32 }
 0x1a8   :  { %v2273_v7 = vadd.f32 %v941_v6, %v3477_v38  ;;  %v943_v8 = vpop.f32.mrb[11].mxu0  ;;  %1685 = vmatmul.mubr.bf16.gmra.mrb[8].mxu1 %v3497_v24  ;;  %v1004_v10 = vmax.f32 %v2271_v41, 0.0 }
 0x1a9   :  { %v2274_v9 = vadd.f32 %v943_v8, %v3481_v39  ;;  %v1005_v13 = vmax.f32 %v2272_v5, 0.0 }
 0x1aa   :  { %v1006_v11 = vmax.f32 %v2273_v7, 0.0 }
 0x1ab   :  { %v1007_v15 = vmax.f32 %v2274_v9, 0.0 }
 0x1ac   :  { %v3507_v16 = vpack.c.bf16 %v1006_v11, %v1004_v10 }
 0x1ad   :  { %v3509_v17 = vpack.c.bf16 %v1007_v15, %v1005_v13  ;;  %v947_v18 = vpop.f32.mrb[12].mxu0 }
 0x1ae   :  { %v2275_v19 = vadd.f32 %v947_v18, %v3477_v38  ;;  %v949_v20 = vpop.f32.mrb[13].mxu0 }
 0x1af   :  { %v2276_v21 = vadd.f32 %v949_v20, %v3481_v39  ;;  %v951_v23 = vpop.f32.mrb[14].mxu0  ;;  %1694 = vmatprep.mubr.bf16.mxu1 %v3509_v17 }
 0x1b0   :  { %v2277_v25 = vadd.f32 %v951_v23, %v3477_v38  ;;  %v953_v26 = vpop.f32.mrb[15].mxu0  ;;  %1695 = vmatmul.mubr.bf16.gmra.mrb[12].mxu1 %v3507_v16  ;;  %v1008_v28 = vmax.f32 %v2275_v19, 0.0 }
 0x1b1   :  { %v2278_v27 = vadd.f32 %v953_v26, %v3481_v39  ;;  %v1009_v30 = vmax.f32 %v2276_v21, 0.0 }
 0x1b2   :  { %v1010_v29 = vmax.f32 %v2277_v25, 0.0 }
 0x1b3   :  { %v1011_v35 = vmax.f32 %v2278_v27, 0.0 }
 0x1b4   :  { %v3517_v40 = vpack.c.bf16 %v1010_v29, %v1008_v28 }
 0x1b5   :  { %v3519_v42 = vpack.c.bf16 %v1011_v35, %v1009_v30  ;;  %v957_v43 = vpop.f32.mrb[16].mxu0 }
 0x1b6   :  { %v2279_v44 = vadd.f32 %v957_v43, %v3477_v38  ;;  %v959_v46 = vpop.f32.mrb[17].mxu0 }
 0x1b7   :  { %v2280_v50 = vadd.f32 %v959_v46, %v3481_v39  ;;  %v961_v51 = vpop.f32.mrb[18].mxu0  ;;  %1704 = vmatprep.mubr.bf16.mxu1 %v3519_v42 }
 0x1b8   :  { %v2281_v37 = vadd.f32 %v961_v51, %v3477_v38  ;;  %v963_v52 = vpop.f32.mrb[19].mxu0  ;;  %1705 = vmatmul.mubr.bf16.gmra.mrb[16].mxu1 %v3517_v40  ;;  %v1012_v54 = vmax.f32 %v2279_v44, 0.0 }
 0x1b9   :  { %v2282_v53 = vadd.f32 %v963_v52, %v3481_v39  ;;  %v1013_v61 = vmax.f32 %v2280_v50, 0.0 }
 0x1ba   :  { %v1014_v56 = vmax.f32 %v2281_v37, 0.0 }
 0x1bb   :  { %v1015_v62 = vmax.f32 %v2282_v53, 0.0 }
 0x1bc   :  { %v3527_v63 = vpack.c.bf16 %v1014_v56, %v1012_v54 }
 0x1bd   :  { %v3529_v0 = vpack.c.bf16 %v1015_v62, %v1013_v61  ;;  %v967_v47 = vpop.f32.mrb[20].mxu0  ;;  %v2696_v61 = vld [vmem:[%s3915_s2 + $0x200] ss:$8 sps:$4 sm:$0xff]  }
 0x1be   :  { %v2283_v55 = vadd.f32 %v967_v47, %v3477_v38  ;;  %v969_v57 = vpop.f32.mrb[21].mxu0  ;;  %v2702_v62 = vld [vmem:[%s3915_s2 + $0x220] ss:$8 sps:$4 sm:$0xff]   ;;  %v2705_v47 = vld [vmem:[%s3915_s2 + $0x230] ss:$8 sps:$4 sm:$0xff]  }
 0x1bf   :  { %v2284_v2 = vadd.f32 %v969_v57, %v3481_v39  ;;  %v971_v4 = vpop.f32.mrb[22].mxu0  ;;  %1714 = vmatprep.mubr.bf16.mxu1 %v3529_v0  ;;  %v2708_v57 = vld [vmem:[%s3915_s2 + $0x240] ss:$8 sps:$4 sm:$0xff]  }
 0x1c0   :  { %v2285_v12 = vadd.f32 %v971_v4, %v3477_v38  ;;  %v973_v14 = vpop.f32.mrb[23].mxu0  ;;  %1715 = vmatmul.mubr.bf16.gmra.mrb[20].mxu1 %v3527_v63  ;;  %v1016_v34 = vmax.f32 %v2283_v55, 0.0  ;;  %v2710_v55 = vld [vmem:[%s3915_s2 + $0x244] ss:$8 sps:$4 sm:$0xff]   ;;  %v2711_v4 = vld [vmem:[%s3915_s2 + $0x250] ss:$8 sps:$4 sm:$0xff]  }
 0x1c1   :  { %v2286_v22 = vadd.f32 %v973_v14, %v3481_v39  ;;  %v1017_v3 = vmax.f32 %v2284_v2, 0.0  ;;  %v2713_v2 = vld [vmem:[%s3915_s2 + $0x254] ss:$8 sps:$4 sm:$0xff]   ;;  %v2714_v14 = vld [vmem:[%s3915_s2 + $0x260] ss:$8 sps:$4 sm:$0xff]  }
 0x1c2   :  { %v1018_v41 = vmax.f32 %v2285_v12, 0.0  ;;  %v2716_v12 = vld [vmem:[%s3915_s2 + $0x264] ss:$8 sps:$4 sm:$0xff]  }
 0x1c3   :  { %v1019_v5 = vmax.f32 %v2286_v22, 0.0  ;;  %v2719_v22 = vld [vmem:[%s3915_s2 + $0x274] ss:$8 sps:$4 sm:$0xff]  }
 0x1c4   :  { %v3537_v6 = vpack.c.bf16 %v1018_v41, %v1016_v34  ;;  %v2717_v34 = vld [vmem:[%s3915_s2 + $0x270] ss:$8 sps:$4 sm:$0xff]   ;;  %v2722_v41 = vld [vmem:[%s3915_s2 + $0x284] ss:$8 sps:$4 sm:$0xff]  }
 0x1c5   :  { %v3539_v7 = vpack.c.bf16 %v1019_v5, %v1017_v3  ;;  %v977_v8 = vpop.f32.mrb[24].mxu0  ;;  %v2720_v3 = vld [vmem:[%s3915_s2 + $0x280] ss:$8 sps:$4 sm:$0xff]   ;;  %v2725_v5 = vld [vmem:[%s3915_s2 + $0x294] ss:$8 sps:$4 sm:$0xff]  }
 0x1c6   :  { %v2287_v9 = vadd.f32 %v977_v8, %v3477_v38  ;;  %v979_v10 = vpop.f32.mrb[25].mxu0  ;;  %v2723_v8 = vld [vmem:[%s3915_s2 + $0x290] ss:$8 sps:$4 sm:$0xff]  }
 0x1c7   :  { %v2288_v11 = vadd.f32 %v979_v10, %v3481_v39  ;;  %v981_v13 = vpop.f32.mrb[26].mxu0  ;;  %1724 = vmatprep.mubr.bf16.mxu1 %v3539_v7  ;;  %v2726_v10 = vld [vmem:[%s3915_s2 + $0x2a0] ss:$8 sps:$4 sm:$0xff]  }
 0x1c8   :  { %v2289_v15 = vadd.f32 %v981_v13, %v3477_v38  ;;  %v983_v18 = vpop.f32.mrb[27].mxu0  ;;  %1725 = vmatmul.mubr.bf16.gmra.mrb[24].mxu1 %v3537_v6  ;;  %v1020_v20 = vmax.f32 %v2287_v9, 0.0  ;;  %v2728_v9 = vld [vmem:[%s3915_s2 + $0x2a4] ss:$8 sps:$4 sm:$0xff]   ;;  %v2729_v13 = vld [vmem:[%s3915_s2 + $0x2b0] ss:$8 sps:$4 sm:$0xff]  }
 0x1c9   :  { %v2290_v19 = vadd.f32 %v983_v18, %v3481_v39  ;;  %v1021_v23 = vmax.f32 %v2288_v11, 0.0  ;;  %v2731_v11 = vld [vmem:[%s3915_s2 + $0x2b4] ss:$8 sps:$4 sm:$0xff]   ;;  %v2732_v18 = vld [vmem:[%s3915_s2 + $0x2c0] ss:$8 sps:$4 sm:$0xff]  }
 0x1ca   :  { %v1022_v21 = vmax.f32 %v2289_v15, 0.0  ;;  %v2734_v15 = vld [vmem:[%s3915_s2 + $0x2c4] ss:$8 sps:$4 sm:$0xff]  }
 0x1cb   :  { %v1023_v25 = vmax.f32 %v2290_v19, 0.0  ;;  %v2737_v19 = vld [vmem:[%s3915_s2 + $0x2d4] ss:$8 sps:$4 sm:$0xff]  }
 0x1cc   :  { %v3547_v26 = vpack.c.bf16 %v1022_v21, %v1020_v20  ;;  %v2735_v20 = vld [vmem:[%s3915_s2 + $0x2d0] ss:$8 sps:$4 sm:$0xff]   ;;  %v2740_v21 = vld [vmem:[%s3915_s2 + $0x2e4] ss:$8 sps:$4 sm:$0xff]  }
 0x1cd   :  { %v3549_v27 = vpack.c.bf16 %v1023_v25, %v1021_v23  ;;  %v987_v28 = vpop.f32.mrb[28].mxu0  ;;  %v2738_v23 = vld [vmem:[%s3915_s2 + $0x2e0] ss:$8 sps:$4 sm:$0xff]   ;;  %v2743_v25 = vld [vmem:[%s3915_s2 + $0x2f4] ss:$8 sps:$4 sm:$0xff]  }
 0x1ce   :  { %v2291_v29 = vadd.f32 %v987_v28, %v3477_v38  ;;  %v989_v30 = vpop.f32.mrb[29].mxu0  ;;  %v2741_v28 = vld [vmem:[%s3915_s2 + $0x2f0] ss:$8 sps:$4 sm:$0xff]  }
 0x1cf   :  { %v2292_v35 = vadd.f32 %v989_v30, %v3481_v39  ;;  %v991_v43 = vpop.f32.mrb[30].mxu0  ;;  %1734 = vmatprep.mubr.bf16.mxu1 %v3549_v27 }
 0x1d0   :  { %v2293_v44 = vadd.f32 %v991_v43, %v3477_v38  ;;  %v993_v46 = vpop.f32.mrb[31].mxu0  ;;  %1735 = vmatmul.mubr.bf16.gmra.mrb[28].mxu1 %v3547_v26  ;;  %v1024_v51 = vmax.f32 %v2291_v29, 0.0  ;;  %v2701_v38 = vld [vmem:[%s3915_s2 + $0x214] ss:$8 sps:$4 sm:$0xff]  }
 0x1d1   :  { %v2294_v50 = vadd.f32 %v993_v46, %v3481_v39  ;;  %1777 = vmatprep.mubr.bf16.mxu1 %v3489_v60  ;;  %v1025_v52 = vmax.f32 %v2292_v35, 0.0  ;;  %v2699_v39 = vld [vmem:[%s3915_s2 + $0x210] ss:$8 sps:$4 sm:$0xff]   ;;  %v2704_v60 = vld [vmem:[%s3915_s2 + $0x224] ss:$8 sps:$4 sm:$0xff]  }
 0x1d2   :  { %v1026_v37 = vmax.f32 %v2293_v44, 0.0  ;;  %v2746_v29 = vld [vmem:[%s3914_s0 + $0x10] sm:$0xff]  ;;  %v2747_v43 = vld [vmem:[%s3914_s0 + $0x18] sm:$0xff] }
 0x1d3   :  { %v1027_v53 = vmax.f32 %v2294_v50, 0.0 }
 0x1d4   :  { %v3558_v54 = vpack.c.bf16 %v1026_v37, %v1024_v51 }
 0x1d5   :  { %v3560_v56 = vpack.c.bf16 %v1027_v53, %v1025_v52 }
 0x1d8   :  { %1778 = vmatmul.mubr.bf16.vlgmr.msra.gmra.mrb[0].mxu1 %v3487_v59  ;;  %v2707_v59 = vld [vmem:[%s3915_s2 + $0x234] ss:$8 sps:$4 sm:$0xff]  }
 0x1d9   :  { %1787 = vmatprep.mubr.bf16.mxu1 %v3499_v32  ;;  %1859 = vmatpush1.bf16.msra.mxu1 %v2696_v61 }
 0x1da   :  { %1860 = vmatprep.subr.bf16.mxu1 %v2701_v38 }
 0x1dd   :  { %1861 = vmatpush1.bf16.msra.mxu1 %v2699_v39 }
 0x1de   :  { %1862 = vmatprep.subr.bf16.mxu1 %v2704_v60  ;;  %v2749_v60 = vld [vmem:[%s3914_s0 + $0x28] sm:$0xff] }
 0x1e0   :  { %1788 = vmatmul.mubr.bf16.gmra.mrb[4].mxu1 %v3497_v24 }
 0x1e1   :  { %1797 = vmatprep.mubr.bf16.mxu1 %v3509_v17  ;;  %1863 = vmatpush1.bf16.msra.mxu1 %v2702_v62 }
 0x1e2   :  { %1864 = vmatprep.subr.bf16.mxu1 %v2707_v59 }
 0x1e5   :  { %1865 = vmatpush1.bf16.msra.mxu1 %v2705_v47 }
 0x1e6   :  { %1866 = vmatprep.subr.bf16.mxu1 %v2710_v55  ;;  %v2750_v55 = vld [vmem:[%s3914_s0 + $0x30] sm:$0xff] }
 0x1e8   :  { %1798 = vmatmul.mubr.bf16.gmra.mrb[8].mxu1 %v3507_v16 }
 0x1e9   :  { %1807 = vmatprep.mubr.bf16.mxu1 %v3519_v42  ;;  %1867 = vmatpush1.bf16.msra.mxu1 %v2708_v57 }
 0x1ea   :  { %1868 = vmatprep.subr.bf16.mxu1 %v2713_v2 }
 0x1ed   :  { %1869 = vmatpush1.bf16.msra.mxu1 %v2711_v4  ;;  %v2751_v4 = vld [vmem:[%s3914_s0 + $0x38] sm:$0xff] }
 0x1ee   :  { %1870 = vmatprep.subr.bf16.mxu1 %v2716_v12 }
 0x1f0   :  { %1808 = vmatmul.mubr.bf16.gmra.mrb[12].mxu1 %v3517_v40 }
 0x1f1   :  { %1817 = vmatprep.mubr.bf16.mxu1 %v3529_v0  ;;  %1871 = vmatpush1.bf16.msra.mxu1 %v2714_v14 }
 0x1f2   :  { %1872 = vmatprep.subr.bf16.mxu1 %v2719_v22 }
 0x1f5   :  { %1873 = vmatpush1.bf16.msra.mxu1 %v2717_v34 }
 0x1f6   :  { %1874 = vmatprep.subr.bf16.mxu1 %v2722_v41 }
 0x1f8   :  { %1818 = vmatmul.mubr.bf16.gmra.mrb[16].mxu1 %v3527_v63 }
 0x1f9   :  { %1827 = vmatprep.mubr.bf16.mxu1 %v3539_v7  ;;  %1875 = vmatpush1.bf16.msra.mxu1 %v2720_v3 }
 0x1fa   :  { %1876 = vmatprep.subr.bf16.mxu1 %v2725_v5 }
 0x1fd   :  { %1877 = vmatpush1.bf16.msra.mxu1 %v2723_v8 }
 0x1fe   :  { %1878 = vmatprep.subr.bf16.mxu1 %v2728_v9  ;;  %v2752_v9 = vld [vmem:[%s3914_s0 + $0x40] sm:$0xff] }
 0x200   :  { %1828 = vmatmul.mubr.bf16.gmra.mrb[20].mxu1 %v3537_v6 }
 0x201   :  { %1837 = vmatprep.mubr.bf16.mxu1 %v3549_v27  ;;  %1879 = vmatpush1.bf16.msra.mxu1 %v2726_v10 }
 0x202   :  { %1880 = vmatprep.subr.bf16.mxu1 %v2731_v11 }
 0x205   :  { %1881 = vmatpush1.bf16.msra.mxu1 %v2729_v13 }
 0x206   :  { %1882 = vmatprep.subr.bf16.mxu1 %v2734_v15  ;;  %v2753_v15 = vld [vmem:[%s3914_s0 + $0x48] sm:$0xff] }
 0x208   :  { %1838 = vmatmul.mubr.bf16.gmra.mrb[24].mxu1 %v3547_v26 }
 0x209   :  { %1847 = vmatprep.mubr.bf16.mxu1 %v3560_v56  ;;  %1883 = vmatpush1.bf16.msra.mxu1 %v2732_v18 }
 0x20a   :  { %1884 = vmatprep.subr.bf16.mxu1 %v2737_v19 }
 0x20d   :  { %1885 = vmatpush1.bf16.msra.mxu1 %v2735_v20 }
 0x20e   :  { %1886 = vmatprep.subr.bf16.mxu1 %v2740_v21  ;;  %v2754_v21 = vld [vmem:[%s3914_s0 + $0x50] sm:$0xff] }
 0x210   :  { %1848 = vmatmul.mubr.bf16.gmra.mrb[28].mxu1 %v3558_v54 }
 0x211   :  { %1887 = vmatpush1.bf16.msra.mxu1 %v2738_v23  ;;  %1890 = vmatprep.mubr.bf16.mxu1 %v3499_v32 }
 0x212   :  { %1888 = vmatprep.subr.bf16.mxu1 %v2743_v25 }
 0x215   :  { %1889 = vmatpush1.bf16.msra.mxu1 %v2741_v28  ;;  %v2755_v28 = vld [vmem:[%s3914_s0 + $0x58] sm:$0xff] }
 0x218   :  { %1891 = vmatmul.mubr.bf16.vlgmr.msra.gmra.mrb[0].mxu1 %v3497_v24  ;;  %v1140_v24 = vld [vmem:[%s3917_s4] sm:$0x3] }
 0x219   :  { %1900 = vmatprep.mubr.bf16.mxu1 %v3509_v17  ;;  %v3691_v32 = vrot.slane %v1140_v24, %v169_v33 }
 0x220   :  { %1901 = vmatmul.mubr.bf16.gmra.mrb[4].mxu1 %v3507_v16  ;;  %v3695_v16 = vrot.slane %v1140_v24, %v173_v36 }
 0x221   :  { %1910 = vmatprep.mubr.bf16.mxu1 %v3519_v42 }
 0x228   :  { %1911 = vmatmul.mubr.bf16.gmra.mrb[8].mxu1 %v3517_v40 }
 0x229   :  { %1920 = vmatprep.mubr.bf16.mxu1 %v3529_v0 }
 0x230   :  { %1921 = vmatmul.mubr.bf16.gmra.mrb[12].mxu1 %v3527_v63 }
 0x231   :  { %1930 = vmatprep.mubr.bf16.mxu1 %v3539_v7 }
 0x238   :  { %1931 = vmatmul.mubr.bf16.gmra.mrb[16].mxu1 %v3537_v6 }
 0x239   :  { %1940 = vmatprep.mubr.bf16.mxu1 %v3549_v27 }
 0x240   :  { %1941 = vmatmul.mubr.bf16.gmra.mrb[20].mxu1 %v3547_v26 }
 0x241   :  { %1950 = vmatprep.mubr.bf16.mxu1 %v3560_v56  ;;  %v2748_v56 = vld [vmem:[%s3914_s0 + $0x20] sm:$0xff] }
 0x248   :  { %1951 = vmatmul.mubr.bf16.gmra.mrb[24].mxu1 %v3558_v54 }
 0x249   :  { %1960 = vmatprep.mubr.bf16.mxu1 %v2772_v1 }
 0x250   :  { %1961 = vmatmul.mubr.bf16.gmra.mrb[28].mxu1 %v2772_v1  ;;  %v2744_v1 = vld [vmem:[%s3914_s0] sm:$0xff] }
 0x2eb   :  { %v1892_v17 = vpop.f32.mrb[0].mxu1 }
 0x2ec   :  { %v2295_v40 = vadd.f32 %v1892_v17, %v3691_v32  ;;  %v1894_v42 = vpop.f32.mrb[1].mxu1 }
 0x2ed   :  { %v2296_v63 = vadd.f32 %v1894_v42, %v3695_v16  ;;  %v1896_v0 = vpop.f32.mrb[2].mxu1 }
 0x2ee   :  { %v1971_v6 = vadd.f32 %v2744_v1, %v2295_v40  ;;  %v2297_v7 = vadd.f32 %v1896_v0, %v3691_v32  ;;  %v1898_v33 = vpop.f32.mrb[3].mxu1 }
 0x2ef   :  { %v1972_v36 = vadd.f32 %v2745_v31, %v2296_v63  ;;  %v2298_v26 = vadd.f32 %v1898_v33, %v3695_v16 }
 0x2f0   :  { %v2003_v27 = vmax.f32 %v1971_v6, 0.0  ;;  %v1973_v30 = vadd.f32 %v2746_v29, %v2297_v7  ;;  %v2756_v7 = vld [vmem:[%s3914_s0 + $0x60] sm:$0xff] }
 0x2f1   :  { %v2004_v35 = vmax.f32 %v1972_v36, 0.0  ;;  %v1974_v44 = vadd.f32 %v2747_v43, %v2298_v26  ;;  %v2757_v26 = vld [vmem:[%s3914_s0 + $0x68] sm:$0xff] }
 0x2f2   :  { %2035 = vst [vmem:[%s3918_s5] sm:$0xff] %v2003_v27  ;;  %v2005_v46 = vmax.f32 %v1973_v30, 0.0 }
 0x2f3   :  { %2036 = vst [vmem:[%s3918_s5 + $0x8] sm:$0xff] %v2004_v35  ;;  %v2006_v50 = vmax.f32 %v1974_v44, 0.0  ;;  %v1902_v51 = vpop.f32.mrb[4].mxu1  ;;  %v2758_v35 = vld [vmem:[%s3914_s0 + $0x70] sm:$0xff] }
 0x2f4   :  { %2037 = vst [vmem:[%s3918_s5 + $0x10] sm:$0xff] %v2005_v46  ;;  %v2299_v37 = vadd.f32 %v1902_v51, %v3691_v32  ;;  %v1904_v52 = vpop.f32.mrb[5].mxu1  ;;  %v2759_v46 = vld [vmem:[%s3914_s0 + $0x78] sm:$0xff] }
 0x2f5   :  { %2038 = vst [vmem:[%s3918_s5 + $0x18] sm:$0xff] %v2006_v50  ;;  %v2300_v53 = vadd.f32 %v1904_v52, %v3695_v16  ;;  %v1906_v54 = vpop.f32.mrb[6].mxu1 }
 0x2f6   :  { %v1975_v61 = vadd.f32 %v2748_v56, %v2299_v37  ;;  %v2301_v38 = vadd.f32 %v1906_v54, %v3691_v32  ;;  %v1908_v39 = vpop.f32.mrb[7].mxu1 }
 0x2f7   :  { %v1976_v62 = vadd.f32 %v2749_v60, %v2300_v53  ;;  %v2302_v59 = vadd.f32 %v1908_v39, %v3695_v16 }
 0x2f8   :  { %v2007_v47 = vmax.f32 %v1975_v61, 0.0  ;;  %v1977_v57 = vadd.f32 %v2750_v55, %v2301_v38  ;;  %v2760_v38 = vld [vmem:[%s3914_s0 + $0x80] sm:$0xff] }
 0x2f9   :  { %v2008_v2 = vmax.f32 %v1976_v62, 0.0  ;;  %v1978_v12 = vadd.f32 %v2751_v4, %v2302_v59  ;;  %v2761_v59 = vld [vmem:[%s3914_s0 + $0x88] sm:$0xff] }
 0x2fa   :  { %2039 = vst [vmem:[%s3918_s5 + $0x20] sm:$0xff] %v2007_v47  ;;  %v2009_v14 = vmax.f32 %v1977_v57, 0.0 }
 0x2fb   :  { %2040 = vst [vmem:[%s3918_s5 + $0x28] sm:$0xff] %v2008_v2  ;;  %v2010_v22 = vmax.f32 %v1978_v12, 0.0  ;;  %v1912_v34 = vpop.f32.mrb[8].mxu1  ;;  %v2762_v2 = vld [vmem:[%s3914_s0 + $0x90] sm:$0xff] }
 0x2fc   :  { %2041 = vst [vmem:[%s3918_s5 + $0x30] sm:$0xff] %v2009_v14  ;;  %v2303_v41 = vadd.f32 %v1912_v34, %v3691_v32  ;;  %v1914_v3 = vpop.f32.mrb[9].mxu1  ;;  %v2763_v14 = vld [vmem:[%s3914_s0 + $0x98] sm:$0xff] }
 0x2fd   :  { %2042 = vst [vmem:[%s3918_s5 + $0x38] sm:$0xff] %v2010_v22  ;;  %v2304_v5 = vadd.f32 %v1914_v3, %v3695_v16  ;;  %v1916_v8 = vpop.f32.mrb[10].mxu1 }
 0x2fe   :  { %v1979_v10 = vadd.f32 %v2752_v9, %v2303_v41  ;;  %v2305_v11 = vadd.f32 %v1916_v8, %v3691_v32  ;;  %v1918_v13 = vpop.f32.mrb[11].mxu1 }
 0x2ff   :  { %v1980_v18 = vadd.f32 %v2753_v15, %v2304_v5  ;;  %v2306_v19 = vadd.f32 %v1918_v13, %v3695_v16 }
 0x300   :  { %v2011_v20 = vmax.f32 %v1979_v10, 0.0  ;;  %v1981_v23 = vadd.f32 %v2754_v21, %v2305_v11  ;;  %v2764_v11 = vld [vmem:[%s3914_s0 + $0xa0] sm:$0xff] }
 0x301   :  { %v2012_v25 = vmax.f32 %v1980_v18, 0.0  ;;  %v1982_v24 = vadd.f32 %v2755_v28, %v2306_v19  ;;  %v2765_v19 = vld [vmem:[%s3914_s0 + $0xa8] sm:$0xff] }
 0x302   :  { %2043 = vst [vmem:[%s3918_s5 + $0x40] sm:$0xff] %v2011_v20  ;;  %v2013_v17 = vmax.f32 %v1981_v23, 0.0 }
 0x303   :  { %2044 = vst [vmem:[%s3918_s5 + $0x48] sm:$0xff] %v2012_v25  ;;  %v2014_v40 = vmax.f32 %v1982_v24, 0.0  ;;  %v1922_v42 = vpop.f32.mrb[12].mxu1  ;;  %v2766_v25 = vld [vmem:[%s3914_s0 + $0xb0] sm:$0xff] }
 0x304   :  { %2045 = vst [vmem:[%s3918_s5 + $0x50] sm:$0xff] %v2013_v17  ;;  %v2307_v63 = vadd.f32 %v1922_v42, %v3691_v32  ;;  %v1924_v0 = vpop.f32.mrb[13].mxu1  ;;  %v2767_v17 = vld [vmem:[%s3914_s0 + $0xb8] sm:$0xff] }
 0x305   :  { %2046 = vst [vmem:[%s3918_s5 + $0x58] sm:$0xff] %v2014_v40  ;;  %v2308_v1 = vadd.f32 %v1924_v0, %v3695_v16  ;;  %v1926_v6 = vpop.f32.mrb[14].mxu1 }
 0x306   :  { %v1983_v33 = vadd.f32 %v2756_v7, %v2307_v63  ;;  %v2309_v31 = vadd.f32 %v1926_v6, %v3691_v32  ;;  %v1928_v36 = vpop.f32.mrb[15].mxu1 }
 0x307   :  { %v1984_v27 = vadd.f32 %v2757_v26, %v2308_v1  ;;  %v2310_v29 = vadd.f32 %v1928_v36, %v3695_v16 }
 0x308   :  { %v2015_v30 = vmax.f32 %v1983_v33, 0.0  ;;  %v1985_v43 = vadd.f32 %v2758_v35, %v2309_v31  ;;  %v2768_v31 = vld [vmem:[%s3914_s0 + $0xc0] sm:$0xff] }
 0x309   :  { %v2016_v44 = vmax.f32 %v1984_v27, 0.0  ;;  %v1986_v50 = vadd.f32 %v2759_v46, %v2310_v29  ;;  %v2769_v29 = vld [vmem:[%s3914_s0 + $0xc8] sm:$0xff] }
 0x30a   :  { %2047 = vst [vmem:[%s3918_s5 + $0x60] sm:$0xff] %v2015_v30  ;;  %v2017_v51 = vmax.f32 %v1985_v43, 0.0 }
 0x30b   :  { %2048 = vst [vmem:[%s3918_s5 + $0x68] sm:$0xff] %v2016_v44  ;;  %v2018_v37 = vmax.f32 %v1986_v50, 0.0  ;;  %v1932_v52 = vpop.f32.mrb[16].mxu1  ;;  %v2770_v44 = vld [vmem:[%s3914_s0 + $0xd0] sm:$0xff] }
 0x30c   :  { %2049 = vst [vmem:[%s3918_s5 + $0x70] sm:$0xff] %v2017_v51  ;;  %v2311_v53 = vadd.f32 %v1932_v52, %v3691_v32  ;;  %v1934_v54 = vpop.f32.mrb[17].mxu1  ;;  %v2771_v51 = vld [vmem:[%s3914_s0 + $0xd8] sm:$0xff] }
 0x30d   :  { %2050 = vst [vmem:[%s3918_s5 + $0x78] sm:$0xff] %v2018_v37  ;;  %v2312_v56 = vadd.f32 %v1934_v54, %v3695_v16  ;;  %v1936_v61 = vpop.f32.mrb[18].mxu1 }
 0x30e   :  { %v1987_v39 = vadd.f32 %v2760_v38, %v2311_v53  ;;  %v2313_v60 = vadd.f32 %v1936_v61, %v3691_v32  ;;  %v1938_v62 = vpop.f32.mrb[19].mxu1 }
 0x30f   :  { %v1988_v47 = vadd.f32 %v2761_v59, %v2312_v56  ;;  %v2314_v55 = vadd.f32 %v1938_v62, %v3695_v16 }
 0x310   :  { %v2019_v57 = vmax.f32 %v1987_v39, 0.0  ;;  %v1989_v4 = vadd.f32 %v2762_v2, %v2313_v60 }
 0x311   :  { %v2020_v12 = vmax.f32 %v1988_v47, 0.0  ;;  %v1990_v22 = vadd.f32 %v2763_v14, %v2314_v55 }
 0x312   :  { %2051 = vst [vmem:[%s3918_s5 + $0x80] sm:$0xff] %v2019_v57  ;;  %v2021_v34 = vmax.f32 %v1989_v4, 0.0 }
 0x313   :  { %2052 = vst [vmem:[%s3918_s5 + $0x88] sm:$0xff] %v2020_v12  ;;  %v2022_v41 = vmax.f32 %v1990_v22, 0.0  ;;  %v1942_v3 = vpop.f32.mrb[20].mxu1 }
 0x314   :  { %2053 = vst [vmem:[%s3918_s5 + $0x90] sm:$0xff] %v2021_v34  ;;  %v2315_v5 = vadd.f32 %v1942_v3, %v3691_v32  ;;  %v1944_v8 = vpop.f32.mrb[21].mxu1 }
 0x315   :  { %2054 = vst [vmem:[%s3918_s5 + $0x98] sm:$0xff] %v2022_v41  ;;  %v2316_v9 = vadd.f32 %v1944_v8, %v3695_v16  ;;  %v1946_v10 = vpop.f32.mrb[22].mxu1 }
 0x316   :  { %v1991_v13 = vadd.f32 %v2764_v11, %v2315_v5  ;;  %v2317_v15 = vadd.f32 %v1946_v10, %v3691_v32  ;;  %v1948_v18 = vpop.f32.mrb[23].mxu1 }
 0x317   :  { %v1992_v20 = vadd.f32 %v2765_v19, %v2316_v9  ;;  %v2318_v21 = vadd.f32 %v1948_v18, %v3695_v16 }
 0x318   :  { %v2023_v23 = vmax.f32 %v1991_v13, 0.0  ;;  %v1993_v28 = vadd.f32 %v2766_v25, %v2317_v15 }
 0x319   :  { %v2024_v24 = vmax.f32 %v1992_v20, 0.0  ;;  %v1994_v40 = vadd.f32 %v2767_v17, %v2318_v21 }
 0x31a   :  { %2055 = vst [vmem:[%s3918_s5 + $0xa0] sm:$0xff] %v2023_v23  ;;  %v2025_v42 = vmax.f32 %v1993_v28, 0.0 }
 0x31b   :  { %2056 = vst [vmem:[%s3918_s5 + $0xa8] sm:$0xff] %v2024_v24  ;;  %v2026_v63 = vmax.f32 %v1994_v40, 0.0  ;;  %v1952_v0 = vpop.f32.mrb[24].mxu1 }
 0x31c   :  { %2057 = vst [vmem:[%s3918_s5 + $0xb0] sm:$0xff] %v2025_v42  ;;  %v2319_v1 = vadd.f32 %v1952_v0, %v3691_v32  ;;  %v1954_v6 = vpop.f32.mrb[25].mxu1 }
 0x31d   :  { %2058 = vst [vmem:[%s3918_s5 + $0xb8] sm:$0xff] %v2026_v63  ;;  %v2320_v7 = vadd.f32 %v1954_v6, %v3695_v16  ;;  %v1956_v33 = vpop.f32.mrb[26].mxu1 }
 0x31e   :  { %v1995_v36 = vadd.f32 %v2768_v31, %v2319_v1  ;;  %v2321_v26 = vadd.f32 %v1956_v33, %v3691_v32  ;;  %v1958_v27 = vpop.f32.mrb[27].mxu1 }
 0x31f   :  { %v1996_v30 = vadd.f32 %v2769_v29, %v2320_v7  ;;  %v2322_v35 = vadd.f32 %v1958_v27, %v3695_v16 }
 0x320   :  { %v2027_v43 = vmax.f32 %v1995_v36, 0.0  ;;  %v1997_v46 = vadd.f32 %v2770_v44, %v2321_v26 }
 0x321   :  { %v2028_v50 = vmax.f32 %v1996_v30, 0.0  ;;  %v1998_v37 = vadd.f32 %v2771_v51, %v2322_v35 }
 0x322   :  { %2059 = vst [vmem:[%s3918_s5 + $0xc0] sm:$0xff] %v2027_v43  ;;  %v2029_v52 = vmax.f32 %v1997_v46, 0.0 }
 0x323   :  { %2060 = vst [vmem:[%s3918_s5 + $0xc8] sm:$0xff] %v2028_v50  ;;  %v2030_v53 = vmax.f32 %v1998_v37, 0.0  ;;  %v1962_v54 = vpop.f32.mrb[28].mxu1 }
 0x324   :  { %2061 = vst [vmem:[%s3918_s5 + $0xd0] sm:$0xff] %v2029_v52  ;;  %v2323_v56 = vadd.f32 %v1962_v54, %v3691_v32  ;;  %v1964_v61 = vpop.f32.mrb[29].mxu1 }
 0x325   :  { %2062 = vst [vmem:[%s3918_s5 + $0xd8] sm:$0xff] %v2030_v53  ;;  %v2324_v38 = vadd.f32 %v1964_v61, %v3695_v16  ;;  %v1966_v39 = vpop.f32.mrb[30].mxu1 }
 0x326   :  { %v1999_v60 = vadd.f32 %v2323_v56, %v3327_v58  ;;  %v2325_v62 = vadd.f32 %v1966_v39, %v3691_v32  ;;  %v1968_v59 = vpop.f32.mrb[31].mxu1 }
 0x327   :  { %v2000_v47 = vadd.f32 %v2324_v38, %v3296_v48  ;;  %v2326_v55 = vadd.f32 %v1968_v59, %v3695_v16 }
 0x328   :  { %v2031_v57 = vmax.f32 %v1999_v60, 0.0  ;;  %v2001_v2 = vadd.f32 %v2325_v62, %v3332_v45 }
 0x329   :  { %v2032_v4 = vmax.f32 %v2000_v47, 0.0  ;;  %v2002_v12 = vadd.f32 %v2326_v55, %v3301_v49 }
 0x32a   :  { %2063 = vst [vmem:[%s3918_s5 + $0xe0] sm:$0xff] %v2031_v57  ;;  %v2033_v14 = vmax.f32 %v2001_v2, 0.0 }
 0x32b   :  { %2064 = vst [vmem:[%s3918_s5 + $0xe8] sm:$0xff] %v2032_v4  ;;  %v2034_v58 = vmax.f32 %v2002_v12, 0.0 }
 0x32c   :  { %2065 = vst [vmem:[%s3918_s5 + $0xf0] sm:$0xff] %v2033_v14 }
 0x32d   :  { %2066 = vst [vmem:[%s3918_s5 + $0xf8] sm:$0xff] %v2034_v58 }

</bundles_post_ra>
